<compile_context>
chip_gen: v7x
topology: tpu7x:2x2x1
jax: 0.10.0
libtpu: 0.0.40
codegen_flags: <defaults>
</compile_context>

<pallas_src>
import functools

import jax
import jax.numpy as jnp
import numpy as np
from jax.experimental import pallas as pl
from jax.experimental.pallas import tpu as pltpu

MAX_DISP = 4                        # pad_size == max_displacement == 4
N_SHIFT = 2 * MAX_DISP + 1          # 9 displacements per axis
N_DISP = N_SHIFT * N_SHIFT          # 81 displacement channels


def _local_kernel(y_ref, x_ref, wqk_ref, bqk_ref, wred_ref, mask_ref, o_ref,
                  *, H, W, C4):
    """Fused 1x1 convs + correlation + softmax for one batch element.

    Layouts (lane axis = flattened H*W):
      y_ref / x_ref : (C, HW)
      wqk_ref       : (2*C4, 2*C)  block-diag [wq 0; 0 wk]
      bqk_ref       : (2*C4, 1)
      wred_ref      : (9, 9*C4)    block-ones / C4 (channel-reduce matmul weights)
      mask_ref      : (9, 9, HW)   0/1 boundary masks, indexed by dy
      o_ref         : (81, HW)
    """
    HW = H * W
    R = MAX_DISP

    # --- fused 1x1 convolutions: one block-diagonal MXU matmul -----------------------
    inp = jnp.concatenate([y_ref[...], x_ref[...]], axis=0)               # (2C, HW)
    qk = jnp.dot(wqk_ref[...], inp,
                 preferred_element_type=jnp.float32) + bqk_ref[...]       # (2*C4, HW)
    q = qk[:C4, :]                                                        # (C4, HW)
    k = qk[C4:, :]                                                        # (C4, HW)

    # --- correlation: one (9, HW) slab per dy -----------------------------------------
    # corr[(dy+R)*9 + (dx+R), p] = (1/C4) * sum_c q[c, p] * k[c, p + dy*W + dx]
    # The dy*W roll is hoisted out of the dx loop; the channel reduce is done on the
    # MXU via wred; the wrap-around/out-of-range entries are zeroed by a single
    # precomputed-mask multiply per slab.
    slabs = []
    for dy in range(-R, R + 1):
        s_dy = (-(dy * W)) % HW
        k_dy = pltpu.roll(k, s_dy, axis=1) if s_dy else k
        prods = []
        for dx in range(-R, R + 1):
            s_dx = (-dx) % HW
            k_s = pltpu.roll(k_dy, s_dx, axis=1) if s_dx else k_dy
            prods.append(q * k_s)                                         # (C4, HW)
        p_stack = jnp.concatenate(prods, axis=0)                          # (9*C4, HW)
        slab = jnp.dot(wred_ref[...], p_stack,
                       preferred_element_type=jnp.float32)                # (9, HW)
        slabs.append(slab * mask_ref[dy + R])                             # masked slab

    corr = jnp.concatenate(slabs, axis=0)                                 # (81, HW)

    # --- softmax over the 81 displacement channels, single aligned store --------------
    m = jnp.max(corr, axis=0, keepdims=True)
    e = jnp.exp(corr - m)
    inv = 1.0 / jnp.sum(e, axis=0, keepdims=True)
    o_ref[...] = e * inv


def local_module_forward(x, y, params):
    """x, y: (B, C, H, W) float32.  Returns (B, H, W, 81) float32."""
    B, C, H, W = x.shape
    C4 = C // 4
    HW = H * W
    wq, bq, wk, bk = params["wq"], params["bq"], params["wk"], params["bk"]

    # Free reshapes only (no transposes): keep channel-major, flatten spatial.
    x3 = x.reshape(B, C, HW)
    y3 = y.reshape(B, C, HW)

    # Fused block-diagonal conv weight / bias: qk = [wq 0; 0 wk] @ [y; x] + [bq; bk].
    wqk = jnp.zeros((2 * C4, 2 * C), jnp.float32)
    wqk = wqk.at[:C4, :C].set(wq).at[C4:, C:].set(wk)
    bqk = jnp.concatenate([bq, bk]).reshape(2 * C4, 1)

    # Channel-reduce matmul weights (block-ones, 1/C4 normalization folded in).
    wred_np = np.zeros((N_SHIFT, N_SHIFT * C4), np.float32)
    for i in range(N_SHIFT):
        wred_np[i, i * C4:(i + 1) * C4] = 1.0 / C4
    wred = jnp.asarray(wred_np)

    # Precomputed 0/1 boundary masks: mask[dy+4, dx+4, p] = 1 iff the displaced
    # 2-D position (i+dy, j+dx) stays inside the H x W map (p = i*W + j).
    pidx = np.arange(HW)
    ii, jj = pidx // W, pidx % W
    mask_np = np.zeros((N_SHIFT, N_SHIFT, HW), np.float32)
    for dyi, dy in enumerate(range(-MAX_DISP, MAX_DISP + 1)):
        for dxi, dx in enumerate(range(-MAX_DISP, MAX_DISP + 1)):
            ok = (ii + dy >= 0) & (ii + dy < H) & (jj + dx >= 0) & (jj + dx < W)
            mask_np[dyi, dxi] = ok.astype(np.float32)
    mask = jnp.asarray(mask_np)

    cost = pl.CostEstimate(
        flops=int(B * (2 * (2 * C4) * (2 * C) * HW          # fused conv
                       + 2 * N_DISP * C4 * HW               # products + reduce
                       + 5 * N_DISP * HW)),                 # mask + softmax
        transcendentals=int(B * N_DISP * HW),
        bytes_accessed=int(4 * (2 * B * C * HW + B * N_DISP * HW + N_DISP * HW
                                + 2 * C4 * (2 * C + 1) + N_SHIFT * N_SHIFT * C4)),
    )

    out = pl.pallas_call(
        functools.partial(_local_kernel, H=H, W=W, C4=C4),
        out_shape=jax.ShapeDtypeStruct((B, N_DISP, HW), jnp.float32),
        grid=(B,),
        in_specs=[
            pl.BlockSpec((None, C, HW), lambda b: (b, 0, 0)),             # y -> query
            pl.BlockSpec((None, C, HW), lambda b: (b, 0, 0)),             # x -> key
            pl.BlockSpec((2 * C4, 2 * C), lambda b: (0, 0)),              # wqk
            pl.BlockSpec((2 * C4, 1), lambda b: (0, 0)),                  # bqk
            pl.BlockSpec((N_SHIFT, N_SHIFT * C4), lambda b: (0, 0)),      # wred
            pl.BlockSpec((N_SHIFT, N_SHIFT, HW), lambda b: (0, 0, 0)),    # masks
        ],
        out_specs=pl.BlockSpec((None, N_DISP, HW), lambda b: (b, 0, 0)),
        compiler_params=pltpu.CompilerParams(dimension_semantics=("parallel",)),
        cost_estimate=cost,
    )(y3, x3, wqk, bqk, wred, mask)

    # Single cheap layout op to match torch's `out.permute(0, 2, 3, 1)`.
    # (Drop this if the consumer accepts (B, 81, H*W) -- free mem-bound win at scale.)
    return out.reshape(B, N_DISP, H, W).transpose(0, 2, 3, 1)             # (B, H, W, 81)


def _reference(x, y, params):
    """Pure-JAX reference of the same forward pass."""
    B, C, H, W = x.shape
    C4 = C // 4
    wq, bq, wk, bk = params["wq"], params["bq"], params["wk"], params["bk"]
    q = jnp.einsum("oc,bchw->bohw", wq, y) + bq[None, :, None, None]
    k = jnp.einsum("oc,bchw->bohw", wk, x) + bk[None, :, None, None]
    R = MAX_DISP
    kpad = jnp.pad(k, ((0, 0), (0, 0), (R, R), (R, R)))
    corrs = []
    for dy in range(-R, R + 1):
        for dx in range(-R, R + 1):
            shifted = kpad[:, :, R + dy:R + dy + H, R + dx:R + dx + W]
            corrs.append(jnp.sum(q * shifted, axis=1) / C4)
    corr = jnp.stack(corrs, axis=1)                       # (B, 81, H, W)
    corr = corr.transpose(0, 2, 3, 1)                     # (B, H, W, 81)
    return jax.nn.softmax(corr, axis=-1)


def init_params(key, in_dim):
    c4 = in_dim // 4
    k1, k2, k3, k4 = jax.random.split(key, 4)
    return {
        "wq": 0.1 * jax.random.normal(k1, (c4, in_dim), jnp.float32),
        "bq": 0.1 * jax.random.normal(k2, (c4,), jnp.float32),
        "wk": 0.1 * jax.random.normal(k3, (c4, in_dim), jnp.float32),
        "bk": 0.1 * jax.random.normal(k4, (c4,), jnp.float32),
    }


if __name__ == "__main__":
    B, C, H, W = 2, 16, 16, 16        # in_dim=16 -> C//4 = 4 query/key channels
    key = jax.random.PRNGKey(0)
    kx, ky, kp = jax.random.split(key, 3)
    x = jax.random.normal(kx, (B, C, H, W), jnp.float32)
    y = jax.random.normal(ky, (B, C, H, W), jnp.float32)
    params = init_params(kp, C)

    out = local_module_forward(x, y, params)
    out = jax.block_until_ready(out)

    assert out.shape == (B, H, W, N_DISP), out.shape
    ref = _reference(x, y, params)
    assert bool(jnp.allclose(out, ref, atol=2e-5, rtol=2e-5)), "mismatch vs reference"
    print("KERNEL_OK")
</pallas_src>

<mosaic_0001>
module attributes {stable_mosaic.version = 11 : i64} {
  func.func @_local_kernel(%arg0: i32, %arg1: memref<1x16x256xf32, #tpu.memory_space<vmem>>, %arg2: memref<1x16x256xf32, #tpu.memory_space<vmem>>, %arg3: memref<8x32xf32, #tpu.memory_space<vmem>>, %arg4: memref<8x1xf32, #tpu.memory_space<vmem>>, %arg5: memref<9x36xf32, #tpu.memory_space<vmem>>, %arg6: memref<9x9x256xf32, #tpu.memory_space<vmem>>, %arg7: memref<1x81x256xf32, #tpu.memory_space<vmem>>) attributes {dimension_semantics = [#tpu.dimension_semantics<parallel>], iteration_bounds = array<i64: 2>, scalar_prefetch = 0 : i64, scratch_operands = 0 : i64, tpu.core_type = #tpu.core_type<tc>, window_params = [{transform_indices = @transform_0, window_bounds = array<i64: 1, 16, 256>}, {transform_indices = @transform_1, window_bounds = array<i64: 1, 16, 256>}, {pipeline_mode = #tpu.pipeline_mode<synchronous>, transform_indices = @transform_2, window_bounds = array<i64: 8, 32>}, {pipeline_mode = #tpu.pipeline_mode<synchronous>, transform_indices = @transform_3, window_bounds = array<i64: 8, 1>}, {pipeline_mode = #tpu.pipeline_mode<synchronous>, transform_indices = @transform_4, window_bounds = array<i64: 9, 36>}, {pipeline_mode = #tpu.pipeline_mode<synchronous>, transform_indices = @transform_5, window_bounds = array<i64: 9, 9, 256>}, {transform_indices = @transform_6, window_bounds = array<i64: 1, 81, 256>}]} {
    %c0 = arith.constant 0 : index
    %c0_0 = arith.constant 0 : index
    %c0_1 = arith.constant 0 : index
    %0 = vector.load %arg1[%c0, %c0_0, %c0_1] : memref<1x16x256xf32, #tpu.memory_space<vmem>>, vector<1x16x256xf32>
    %1 = vector.shape_cast %0 : vector<1x16x256xf32> to vector<16x256xf32>
    %c0_2 = arith.constant 0 : index
    %c0_3 = arith.constant 0 : index
    %c0_4 = arith.constant 0 : index
    %2 = vector.load %arg2[%c0_2, %c0_3, %c0_4] : memref<1x16x256xf32, #tpu.memory_space<vmem>>, vector<1x16x256xf32>
    %3 = vector.shape_cast %2 : vector<1x16x256xf32> to vector<16x256xf32>
    %4 = tpu.concatenate %1, %3 in 0 : vector<16x256xf32>, vector<16x256xf32> -> vector<32x256xf32>
    %c0_5 = arith.constant 0 : index
    %c0_6 = arith.constant 0 : index
    %5 = vector.load %arg3[%c0_5, %c0_6] : memref<8x32xf32, #tpu.memory_space<vmem>>, vector<8x32xf32>
    %cst = arith.constant dense<0.000000e+00> : vector<8x256xf32>
    %6 = tpu.matmul %5, %4, %cst {dimension_numbers = #tpu.dot_dimension_numbers<[1], [0], [0], [1], [0, 0, 1, 1], [], []>} : vector<8x32xf32>, vector<32x256xf32>, vector<8x256xf32> -> vector<8x256xf32>
    %c0_7 = arith.constant 0 : index
    %c0_8 = arith.constant 0 : index
    %7 = vector.load %arg4[%c0_7, %c0_8] : memref<8x1xf32, #tpu.memory_space<vmem>>, vector<8x1xf32>
    %8 = vector.broadcast %7 : vector<8x1xf32> to vector<8x256xf32>
    %9 = arith.addf %6, %8 : vector<8x256xf32>
    %10 = vector.extract_strided_slice %9 {offsets = [0, 0], sizes = [4, 256], strides = [1, 1]} : vector<8x256xf32> to vector<4x256xf32>
    %11 = vector.extract_strided_slice %9 {offsets = [4, 0], sizes = [4, 256], strides = [1, 1]} : vector<8x256xf32> to vector<4x256xf32>
    %c64_i32 = arith.constant 64 : i32
    %12 = tpu.dynamic_rotate %11 by %c64_i32 dim 1 : vector<4x256xf32>, i32 -> vector<4x256xf32>
    %c4_i32 = arith.constant 4 : i32
    %13 = tpu.dynamic_rotate %12 by %c4_i32 dim 1 : vector<4x256xf32>, i32 -> vector<4x256xf32>
    %14 = arith.mulf %10, %13 : vector<4x256xf32>
    %c3_i32 = arith.constant 3 : i32
    %15 = tpu.dynamic_rotate %12 by %c3_i32 dim 1 : vector<4x256xf32>, i32 -> vector<4x256xf32>
    %16 = arith.mulf %10, %15 : vector<4x256xf32>
    %c2_i32 = arith.constant 2 : i32
    %17 = tpu.dynamic_rotate %12 by %c2_i32 dim 1 : vector<4x256xf32>, i32 -> vector<4x256xf32>
    %18 = arith.mulf %10, %17 : vector<4x256xf32>
    %c1_i32 = arith.constant 1 : i32
    %19 = tpu.dynamic_rotate %12 by %c1_i32 dim 1 : vector<4x256xf32>, i32 -> vector<4x256xf32>
    %20 = arith.mulf %10, %19 : vector<4x256xf32>
    %21 = arith.mulf %10, %12 : vector<4x256xf32>
    %c255_i32 = arith.constant 255 : i32
    %22 = tpu.dynamic_rotate %12 by %c255_i32 dim 1 : vector<4x256xf32>, i32 -> vector<4x256xf32>
    %23 = arith.mulf %10, %22 : vector<4x256xf32>
    %c254_i32 = arith.constant 254 : i32
    %24 = tpu.dynamic_rotate %12 by %c254_i32 dim 1 : vector<4x256xf32>, i32 -> vector<4x256xf32>
    %25 = arith.mulf %10, %24 : vector<4x256xf32>
    %c253_i32 = arith.constant 253 : i32
    %26 = tpu.dynamic_rotate %12 by %c253_i32 dim 1 : vector<4x256xf32>, i32 -> vector<4x256xf32>
    %27 = arith.mulf %10, %26 : vector<4x256xf32>
    %c252_i32 = arith.constant 252 : i32
    %28 = tpu.dynamic_rotate %12 by %c252_i32 dim 1 : vector<4x256xf32>, i32 -> vector<4x256xf32>
    %29 = arith.mulf %10, %28 : vector<4x256xf32>
    %30 = tpu.concatenate %14, %16, %18, %20, %21, %23, %25, %27, %29 in 0 : vector<4x256xf32>, vector<4x256xf32>, vector<4x256xf32>, vector<4x256xf32>, vector<4x256xf32>, vector<4x256xf32>, vector<4x256xf32>, vector<4x256xf32>, vector<4x256xf32> -> vector<36x256xf32>
    %c0_9 = arith.constant 0 : index
    %c0_10 = arith.constant 0 : index
    %31 = vector.load %arg5[%c0_9, %c0_10] : memref<9x36xf32, #tpu.memory_space<vmem>>, vector<9x36xf32>
    %cst_11 = arith.constant dense<0.000000e+00> : vector<9x256xf32>
    %32 = tpu.matmul %31, %30, %cst_11 {dimension_numbers = #tpu.dot_dimension_numbers<[1], [0], [0], [1], [0, 0, 1, 1], [], []>} : vector<9x36xf32>, vector<36x256xf32>, vector<9x256xf32> -> vector<9x256xf32>
    %c0_12 = arith.constant 0 : index
    %c0_13 = arith.constant 0 : index
    %c0_14 = arith.constant 0 : index
    %33 = vector.load %arg6[%c0_12, %c0_13, %c0_14] : memref<9x9x256xf32, #tpu.memory_space<vmem>>, vector<1x9x256xf32>
    %34 = vector.shape_cast %33 : vector<1x9x256xf32> to vector<9x256xf32>
    %35 = arith.mulf %32, %34 : vector<9x256xf32>
    %c48_i32 = arith.constant 48 : i32
    %36 = tpu.dynamic_rotate %11 by %c48_i32 dim 1 : vector<4x256xf32>, i32 -> vector<4x256xf32>
    %c4_i32_15 = arith.constant 4 : i32
    %37 = tpu.dynamic_rotate %36 by %c4_i32_15 dim 1 : vector<4x256xf32>, i32 -> vector<4x256xf32>
    %38 = arith.mulf %10, %37 : vector<4x256xf32>
    %c3_i32_16 = arith.constant 3 : i32
    %39 = tpu.dynamic_rotate %36 by %c3_i32_16 dim 1 : vector<4x256xf32>, i32 -> vector<4x256xf32>
    %40 = arith.mulf %10, %39 : vector<4x256xf32>
    %c2_i32_17 = arith.constant 2 : i32
    %41 = tpu.dynamic_rotate %36 by %c2_i32_17 dim 1 : vector<4x256xf32>, i32 -> vector<4x256xf32>
    %42 = arith.mulf %10, %41 : vector<4x256xf32>
    %c1_i32_18 = arith.constant 1 : i32
    %43 = tpu.dynamic_rotate %36 by %c1_i32_18 dim 1 : vector<4x256xf32>, i32 -> vector<4x256xf32>
    %44 = arith.mulf %10, %43 : vector<4x256xf32>
    %45 = arith.mulf %10, %36 : vector<4x256xf32>
    %c255_i32_19 = arith.constant 255 : i32
    %46 = tpu.dynamic_rotate %36 by %c255_i32_19 dim 1 : vector<4x256xf32>, i32 -> vector<4x256xf32>
    %47 = arith.mulf %10, %46 : vector<4x256xf32>
    %c254_i32_20 = arith.constant 254 : i32
    %48 = tpu.dynamic_rotate %36 by %c254_i32_20 dim 1 : vector<4x256xf32>, i32 -> vector<4x256xf32>
    %49 = arith.mulf %10, %48 : vector<4x256xf32>
    %c253_i32_21 = arith.constant 253 : i32
    %50 = tpu.dynamic_rotate %36 by %c253_i32_21 dim 1 : vector<4x256xf32>, i32 -> vector<4x256xf32>
    %51 = arith.mulf %10, %50 : vector<4x256xf32>
    %c252_i32_22 = arith.constant 252 : i32
    %52 = tpu.dynamic_rotate %36 by %c252_i32_22 dim 1 : vector<4x256xf32>, i32 -> vector<4x256xf32>
    %53 = arith.mulf %10, %52 : vector<4x256xf32>
    %54 = tpu.concatenate %38, %40, %42, %44, %45, %47, %49, %51, %53 in 0 : vector<4x256xf32>, vector<4x256xf32>, vector<4x256xf32>, vector<4x256xf32>, vector<4x256xf32>, vector<4x256xf32>, vector<4x256xf32>, vector<4x256xf32>, vector<4x256xf32> -> vector<36x256xf32>
    %c0_23 = arith.constant 0 : index
    %c0_24 = arith.constant 0 : index
    %55 = vector.load %arg5[%c0_23, %c0_24] : memref<9x36xf32, #tpu.memory_space<vmem>>, vector<9x36xf32>
    %cst_25 = arith.constant dense<0.000000e+00> : vector<9x256xf32>
    %56 = tpu.matmul %55, %54, %cst_25 {dimension_numbers = #tpu.dot_dimension_numbers<[1], [0], [0], [1], [0, 0, 1, 1], [], []>} : vector<9x36xf32>, vector<36x256xf32>, vector<9x256xf32> -> vector<9x256xf32>
    %c1 = arith.constant 1 : index
    %c0_26 = arith.constant 0 : index
    %c0_27 = arith.constant 0 : index
    %57 = vector.load %arg6[%c1, %c0_26, %c0_27] : memref<9x9x256xf32, #tpu.memory_space<vmem>>, vector<1x9x256xf32>
    %58 = vector.shape_cast %57 : vector<1x9x256xf32> to vector<9x256xf32>
    %59 = arith.mulf %56, %58 : vector<9x256xf32>
    %c32_i32 = arith.constant 32 : i32
    %60 = tpu.dynamic_rotate %11 by %c32_i32 dim 1 : vector<4x256xf32>, i32 -> vector<4x256xf32>
    %c4_i32_28 = arith.constant 4 : i32
    %61 = tpu.dynamic_rotate %60 by %c4_i32_28 dim 1 : vector<4x256xf32>, i32 -> vector<4x256xf32>
    %62 = arith.mulf %10, %61 : vector<4x256xf32>
    %c3_i32_29 = arith.constant 3 : i32
    %63 = tpu.dynamic_rotate %60 by %c3_i32_29 dim 1 : vector<4x256xf32>, i32 -> vector<4x256xf32>
    %64 = arith.mulf %10, %63 : vector<4x256xf32>
    %c2_i32_30 = arith.constant 2 : i32
    %65 = tpu.dynamic_rotate %60 by %c2_i32_30 dim 1 : vector<4x256xf32>, i32 -> vector<4x256xf32>
    %66 = arith.mulf %10, %65 : vector<4x256xf32>
    %c1_i32_31 = arith.constant 1 : i32
    %67 = tpu.dynamic_rotate %60 by %c1_i32_31 dim 1 : vector<4x256xf32>, i32 -> vector<4x256xf32>
    %68 = arith.mulf %10, %67 : vector<4x256xf32>
    %69 = arith.mulf %10, %60 : vector<4x256xf32>
    %c255_i32_32 = arith.constant 255 : i32
    %70 = tpu.dynamic_rotate %60 by %c255_i32_32 dim 1 : vector<4x256xf32>, i32 -> vector<4x256xf32>
    %71 = arith.mulf %10, %70 : vector<4x256xf32>
    %c254_i32_33 = arith.constant 254 : i32
    %72 = tpu.dynamic_rotate %60 by %c254_i32_33 dim 1 : vector<4x256xf32>, i32 -> vector<4x256xf32>
    %73 = arith.mulf %10, %72 : vector<4x256xf32>
    %c253_i32_34 = arith.constant 253 : i32
    %74 = tpu.dynamic_rotate %60 by %c253_i32_34 dim 1 : vector<4x256xf32>, i32 -> vector<4x256xf32>
    %75 = arith.mulf %10, %74 : vector<4x256xf32>
    %c252_i32_35 = arith.constant 252 : i32
    %76 = tpu.dynamic_rotate %60 by %c252_i32_35 dim 1 : vector<4x256xf32>, i32 -> vector<4x256xf32>
    %77 = arith.mulf %10, %76 : vector<4x256xf32>
    %78 = tpu.concatenate %62, %64, %66, %68, %69, %71, %73, %75, %77 in 0 : vector<4x256xf32>, vector<4x256xf32>, vector<4x256xf32>, vector<4x256xf32>, vector<4x256xf32>, vector<4x256xf32>, vector<4x256xf32>, vector<4x256xf32>, vector<4x256xf32> -> vector<36x256xf32>
    %c0_36 = arith.constant 0 : index
    %c0_37 = arith.constant 0 : index
    %79 = vector.load %arg5[%c0_36, %c0_37] : memref<9x36xf32, #tpu.memory_space<vmem>>, vector<9x36xf32>
    %cst_38 = arith.constant dense<0.000000e+00> : vector<9x256xf32>
    %80 = tpu.matmul %79, %78, %cst_38 {dimension_numbers = #tpu.dot_dimension_numbers<[1], [0], [0], [1], [0, 0, 1, 1], [], []>} : vector<9x36xf32>, vector<36x256xf32>, vector<9x256xf32> -> vector<9x256xf32>
    %c2 = arith.constant 2 : index
    %c0_39 = arith.constant 0 : index
    %c0_40 = arith.constant 0 : index
    %81 = vector.load %arg6[%c2, %c0_39, %c0_40] : memref<9x9x256xf32, #tpu.memory_space<vmem>>, vector<1x9x256xf32>
    %82 = vector.shape_cast %81 : vector<1x9x256xf32> to vector<9x256xf32>
    %83 = arith.mulf %80, %82 : vector<9x256xf32>
    %c16_i32 = arith.constant 16 : i32
    %84 = tpu.dynamic_rotate %11 by %c16_i32 dim 1 : vector<4x256xf32>, i32 -> vector<4x256xf32>
    %c4_i32_41 = arith.constant 4 : i32
    %85 = tpu.dynamic_rotate %84 by %c4_i32_41 dim 1 : vector<4x256xf32>, i32 -> vector<4x256xf32>
    %86 = arith.mulf %10, %85 : vector<4x256xf32>
    %c3_i32_42 = arith.constant 3 : i32
    %87 = tpu.dynamic_rotate %84 by %c3_i32_42 dim 1 : vector<4x256xf32>, i32 -> vector<4x256xf32>
    %88 = arith.mulf %10, %87 : vector<4x256xf32>
    %c2_i32_43 = arith.constant 2 : i32
    %89 = tpu.dynamic_rotate %84 by %c2_i32_43 dim 1 : vector<4x256xf32>, i32 -> vector<4x256xf32>
    %90 = arith.mulf %10, %89 : vector<4x256xf32>
    %c1_i32_44 = arith.constant 1 : i32
    %91 = tpu.dynamic_rotate %84 by %c1_i32_44 dim 1 : vector<4x256xf32>, i32 -> vector<4x256xf32>
    %92 = arith.mulf %10, %91 : vector<4x256xf32>
    %93 = arith.mulf %10, %84 : vector<4x256xf32>
    %c255_i32_45 = arith.constant 255 : i32
    %94 = tpu.dynamic_rotate %84 by %c255_i32_45 dim 1 : vector<4x256xf32>, i32 -> vector<4x256xf32>
    %95 = arith.mulf %10, %94 : vector<4x256xf32>
    %c254_i32_46 = arith.constant 254 : i32
    %96 = tpu.dynamic_rotate %84 by %c254_i32_46 dim 1 : vector<4x256xf32>, i32 -> vector<4x256xf32>
    %97 = arith.mulf %10, %96 : vector<4x256xf32>
    %c253_i32_47 = arith.constant 253 : i32
    %98 = tpu.dynamic_rotate %84 by %c253_i32_47 dim 1 : vector<4x256xf32>, i32 -> vector<4x256xf32>
    %99 = arith.mulf %10, %98 : vector<4x256xf32>
    %c252_i32_48 = arith.constant 252 : i32
    %100 = tpu.dynamic_rotate %84 by %c252_i32_48 dim 1 : vector<4x256xf32>, i32 -> vector<4x256xf32>
    %101 = arith.mulf %10, %100 : vector<4x256xf32>
    %102 = tpu.concatenate %86, %88, %90, %92, %93, %95, %97, %99, %101 in 0 : vector<4x256xf32>, vector<4x256xf32>, vector<4x256xf32>, vector<4x256xf32>, vector<4x256xf32>, vector<4x256xf32>, vector<4x256xf32>, vector<4x256xf32>, vector<4x256xf32> -> vector<36x256xf32>
    %c0_49 = arith.constant 0 : index
    %c0_50 = arith.constant 0 : index
    %103 = vector.load %arg5[%c0_49, %c0_50] : memref<9x36xf32, #tpu.memory_space<vmem>>, vector<9x36xf32>
    %cst_51 = arith.constant dense<0.000000e+00> : vector<9x256xf32>
    %104 = tpu.matmul %103, %102, %cst_51 {dimension_numbers = #tpu.dot_dimension_numbers<[1], [0], [0], [1], [0, 0, 1, 1], [], []>} : vector<9x36xf32>, vector<36x256xf32>, vector<9x256xf32> -> vector<9x256xf32>
    %c3 = arith.constant 3 : index
    %c0_52 = arith.constant 0 : index
    %c0_53 = arith.constant 0 : index
    %105 = vector.load %arg6[%c3, %c0_52, %c0_53] : memref<9x9x256xf32, #tpu.memory_space<vmem>>, vector<1x9x256xf32>
    %106 = vector.shape_cast %105 : vector<1x9x256xf32> to vector<9x256xf32>
    %107 = arith.mulf %104, %106 : vector<9x256xf32>
    %c4_i32_54 = arith.constant 4 : i32
    %108 = tpu.dynamic_rotate %11 by %c4_i32_54 dim 1 : vector<4x256xf32>, i32 -> vector<4x256xf32>
    %109 = arith.mulf %10, %108 : vector<4x256xf32>
    %c3_i32_55 = arith.constant 3 : i32
    %110 = tpu.dynamic_rotate %11 by %c3_i32_55 dim 1 : vector<4x256xf32>, i32 -> vector<4x256xf32>
    %111 = arith.mulf %10, %110 : vector<4x256xf32>
    %c2_i32_56 = arith.constant 2 : i32
    %112 = tpu.dynamic_rotate %11 by %c2_i32_56 dim 1 : vector<4x256xf32>, i32 -> vector<4x256xf32>
    %113 = arith.mulf %10, %112 : vector<4x256xf32>
    %c1_i32_57 = arith.constant 1 : i32
    %114 = tpu.dynamic_rotate %11 by %c1_i32_57 dim 1 : vector<4x256xf32>, i32 -> vector<4x256xf32>
    %115 = arith.mulf %10, %114 : vector<4x256xf32>
    %116 = arith.mulf %10, %11 : vector<4x256xf32>
    %c255_i32_58 = arith.constant 255 : i32
    %117 = tpu.dynamic_rotate %11 by %c255_i32_58 dim 1 : vector<4x256xf32>, i32 -> vector<4x256xf32>
    %118 = arith.mulf %10, %117 : vector<4x256xf32>
    %c254_i32_59 = arith.constant 254 : i32
    %119 = tpu.dynamic_rotate %11 by %c254_i32_59 dim 1 : vector<4x256xf32>, i32 -> vector<4x256xf32>
    %120 = arith.mulf %10, %119 : vector<4x256xf32>
    %c253_i32_60 = arith.constant 253 : i32
    %121 = tpu.dynamic_rotate %11 by %c253_i32_60 dim 1 : vector<4x256xf32>, i32 -> vector<4x256xf32>
    %122 = arith.mulf %10, %121 : vector<4x256xf32>
    %c252_i32_61 = arith.constant 252 : i32
    %123 = tpu.dynamic_rotate %11 by %c252_i32_61 dim 1 : vector<4x256xf32>, i32 -> vector<4x256xf32>
    %124 = arith.mulf %10, %123 : vector<4x256xf32>
    %125 = tpu.concatenate %109, %111, %113, %115, %116, %118, %120, %122, %124 in 0 : vector<4x256xf32>, vector<4x256xf32>, vector<4x256xf32>, vector<4x256xf32>, vector<4x256xf32>, vector<4x256xf32>, vector<4x256xf32>, vector<4x256xf32>, vector<4x256xf32> -> vector<36x256xf32>
    %c0_62 = arith.constant 0 : index
    %c0_63 = arith.constant 0 : index
    %126 = vector.load %arg5[%c0_62, %c0_63] : memref<9x36xf32, #tpu.memory_space<vmem>>, vector<9x36xf32>
    %cst_64 = arith.constant dense<0.000000e+00> : vector<9x256xf32>
    %127 = tpu.matmul %126, %125, %cst_64 {dimension_numbers = #tpu.dot_dimension_numbers<[1], [0], [0], [1], [0, 0, 1, 1], [], []>} : vector<9x36xf32>, vector<36x256xf32>, vector<9x256xf32> -> vector<9x256xf32>
    %c4 = arith.constant 4 : index
    %c0_65 = arith.constant 0 : index
    %c0_66 = arith.constant 0 : index
    %128 = vector.load %arg6[%c4, %c0_65, %c0_66] : memref<9x9x256xf32, #tpu.memory_space<vmem>>, vector<1x9x256xf32>
    %129 = vector.shape_cast %128 : vector<1x9x256xf32> to vector<9x256xf32>
    %130 = arith.mulf %127, %129 : vector<9x256xf32>
    %c240_i32 = arith.constant 240 : i32
    %131 = tpu.dynamic_rotate %11 by %c240_i32 dim 1 : vector<4x256xf32>, i32 -> vector<4x256xf32>
    %c4_i32_67 = arith.constant 4 : i32
    %132 = tpu.dynamic_rotate %131 by %c4_i32_67 dim 1 : vector<4x256xf32>, i32 -> vector<4x256xf32>
    %133 = arith.mulf %10, %132 : vector<4x256xf32>
    %c3_i32_68 = arith.constant 3 : i32
    %134 = tpu.dynamic_rotate %131 by %c3_i32_68 dim 1 : vector<4x256xf32>, i32 -> vector<4x256xf32>
    %135 = arith.mulf %10, %134 : vector<4x256xf32>
    %c2_i32_69 = arith.constant 2 : i32
    %136 = tpu.dynamic_rotate %131 by %c2_i32_69 dim 1 : vector<4x256xf32>, i32 -> vector<4x256xf32>
    %137 = arith.mulf %10, %136 : vector<4x256xf32>
    %c1_i32_70 = arith.constant 1 : i32
    %138 = tpu.dynamic_rotate %131 by %c1_i32_70 dim 1 : vector<4x256xf32>, i32 -> vector<4x256xf32>
    %139 = arith.mulf %10, %138 : vector<4x256xf32>
    %140 = arith.mulf %10, %131 : vector<4x256xf32>
    %c255_i32_71 = arith.constant 255 : i32
    %141 = tpu.dynamic_rotate %131 by %c255_i32_71 dim 1 : vector<4x256xf32>, i32 -> vector<4x256xf32>
    %142 = arith.mulf %10, %141 : vector<4x256xf32>
    %c254_i32_72 = arith.constant 254 : i32
    %143 = tpu.dynamic_rotate %131 by %c254_i32_72 dim 1 : vector<4x256xf32>, i32 -> vector<4x256xf32>
    %144 = arith.mulf %10, %143 : vector<4x256xf32>
    %c253_i32_73 = arith.constant 253 : i32
    %145 = tpu.dynamic_rotate %131 by %c253_i32_73 dim 1 : vector<4x256xf32>, i32 -> vector<4x256xf32>
    %146 = arith.mulf %10, %145 : vector<4x256xf32>
    %c252_i32_74 = arith.constant 252 : i32
    %147 = tpu.dynamic_rotate %131 by %c252_i32_74 dim 1 : vector<4x256xf32>, i32 -> vector<4x256xf32>
    %148 = arith.mulf %10, %147 : vector<4x256xf32>
    %149 = tpu.concatenate %133, %135, %137, %139, %140, %142, %144, %146, %148 in 0 : vector<4x256xf32>, vector<4x256xf32>, vector<4x256xf32>, vector<4x256xf32>, vector<4x256xf32>, vector<4x256xf32>, vector<4x256xf32>, vector<4x256xf32>, vector<4x256xf32> -> vector<36x256xf32>
    %c0_75 = arith.constant 0 : index
    %c0_76 = arith.constant 0 : index
    %150 = vector.load %arg5[%c0_75, %c0_76] : memref<9x36xf32, #tpu.memory_space<vmem>>, vector<9x36xf32>
    %cst_77 = arith.constant dense<0.000000e+00> : vector<9x256xf32>
    %151 = tpu.matmul %150, %149, %cst_77 {dimension_numbers = #tpu.dot_dimension_numbers<[1], [0], [0], [1], [0, 0, 1, 1], [], []>} : vector<9x36xf32>, vector<36x256xf32>, vector<9x256xf32> -> vector<9x256xf32>
    %c5 = arith.constant 5 : index
    %c0_78 = arith.constant 0 : index
    %c0_79 = arith.constant 0 : index
    %152 = vector.load %arg6[%c5, %c0_78, %c0_79] : memref<9x9x256xf32, #tpu.memory_space<vmem>>, vector<1x9x256xf32>
    %153 = vector.shape_cast %152 : vector<1x9x256xf32> to vector<9x256xf32>
    %154 = arith.mulf %151, %153 : vector<9x256xf32>
    %c224_i32 = arith.constant 224 : i32
    %155 = tpu.dynamic_rotate %11 by %c224_i32 dim 1 : vector<4x256xf32>, i32 -> vector<4x256xf32>
    %c4_i32_80 = arith.constant 4 : i32
    %156 = tpu.dynamic_rotate %155 by %c4_i32_80 dim 1 : vector<4x256xf32>, i32 -> vector<4x256xf32>
    %157 = arith.mulf %10, %156 : vector<4x256xf32>
    %c3_i32_81 = arith.constant 3 : i32
    %158 = tpu.dynamic_rotate %155 by %c3_i32_81 dim 1 : vector<4x256xf32>, i32 -> vector<4x256xf32>
    %159 = arith.mulf %10, %158 : vector<4x256xf32>
    %c2_i32_82 = arith.constant 2 : i32
    %160 = tpu.dynamic_rotate %155 by %c2_i32_82 dim 1 : vector<4x256xf32>, i32 -> vector<4x256xf32>
    %161 = arith.mulf %10, %160 : vector<4x256xf32>
    %c1_i32_83 = arith.constant 1 : i32
    %162 = tpu.dynamic_rotate %155 by %c1_i32_83 dim 1 : vector<4x256xf32>, i32 -> vector<4x256xf32>
    %163 = arith.mulf %10, %162 : vector<4x256xf32>
    %164 = arith.mulf %10, %155 : vector<4x256xf32>
    %c255_i32_84 = arith.constant 255 : i32
    %165 = tpu.dynamic_rotate %155 by %c255_i32_84 dim 1 : vector<4x256xf32>, i32 -> vector<4x256xf32>
    %166 = arith.mulf %10, %165 : vector<4x256xf32>
    %c254_i32_85 = arith.constant 254 : i32
    %167 = tpu.dynamic_rotate %155 by %c254_i32_85 dim 1 : vector<4x256xf32>, i32 -> vector<4x256xf32>
    %168 = arith.mulf %10, %167 : vector<4x256xf32>
    %c253_i32_86 = arith.constant 253 : i32
    %169 = tpu.dynamic_rotate %155 by %c253_i32_86 dim 1 : vector<4x256xf32>, i32 -> vector<4x256xf32>
    %170 = arith.mulf %10, %169 : vector<4x256xf32>
    %c252_i32_87 = arith.constant 252 : i32
    %171 = tpu.dynamic_rotate %155 by %c252_i32_87 dim 1 : vector<4x256xf32>, i32 -> vector<4x256xf32>
    %172 = arith.mulf %10, %171 : vector<4x256xf32>
    %173 = tpu.concatenate %157, %159, %161, %163, %164, %166, %168, %170, %172 in 0 : vector<4x256xf32>, vector<4x256xf32>, vector<4x256xf32>, vector<4x256xf32>, vector<4x256xf32>, vector<4x256xf32>, vector<4x256xf32>, vector<4x256xf32>, vector<4x256xf32> -> vector<36x256xf32>
    %c0_88 = arith.constant 0 : index
    %c0_89 = arith.constant 0 : index
    %174 = vector.load %arg5[%c0_88, %c0_89] : memref<9x36xf32, #tpu.memory_space<vmem>>, vector<9x36xf32>
    %cst_90 = arith.constant dense<0.000000e+00> : vector<9x256xf32>
    %175 = tpu.matmul %174, %173, %cst_90 {dimension_numbers = #tpu.dot_dimension_numbers<[1], [0], [0], [1], [0, 0, 1, 1], [], []>} : vector<9x36xf32>, vector<36x256xf32>, vector<9x256xf32> -> vector<9x256xf32>
    %c6 = arith.constant 6 : index
    %c0_91 = arith.constant 0 : index
    %c0_92 = arith.constant 0 : index
    %176 = vector.load %arg6[%c6, %c0_91, %c0_92] : memref<9x9x256xf32, #tpu.memory_space<vmem>>, vector<1x9x256xf32>
    %177 = vector.shape_cast %176 : vector<1x9x256xf32> to vector<9x256xf32>
    %178 = arith.mulf %175, %177 : vector<9x256xf32>
    %c208_i32 = arith.constant 208 : i32
    %179 = tpu.dynamic_rotate %11 by %c208_i32 dim 1 : vector<4x256xf32>, i32 -> vector<4x256xf32>
    %c4_i32_93 = arith.constant 4 : i32
    %180 = tpu.dynamic_rotate %179 by %c4_i32_93 dim 1 : vector<4x256xf32>, i32 -> vector<4x256xf32>
    %181 = arith.mulf %10, %180 : vector<4x256xf32>
    %c3_i32_94 = arith.constant 3 : i32
    %182 = tpu.dynamic_rotate %179 by %c3_i32_94 dim 1 : vector<4x256xf32>, i32 -> vector<4x256xf32>
    %183 = arith.mulf %10, %182 : vector<4x256xf32>
    %c2_i32_95 = arith.constant 2 : i32
    %184 = tpu.dynamic_rotate %179 by %c2_i32_95 dim 1 : vector<4x256xf32>, i32 -> vector<4x256xf32>
    %185 = arith.mulf %10, %184 : vector<4x256xf32>
    %c1_i32_96 = arith.constant 1 : i32
    %186 = tpu.dynamic_rotate %179 by %c1_i32_96 dim 1 : vector<4x256xf32>, i32 -> vector<4x256xf32>
    %187 = arith.mulf %10, %186 : vector<4x256xf32>
    %188 = arith.mulf %10, %179 : vector<4x256xf32>
    %c255_i32_97 = arith.constant 255 : i32
    %189 = tpu.dynamic_rotate %179 by %c255_i32_97 dim 1 : vector<4x256xf32>, i32 -> vector<4x256xf32>
    %190 = arith.mulf %10, %189 : vector<4x256xf32>
    %c254_i32_98 = arith.constant 254 : i32
    %191 = tpu.dynamic_rotate %179 by %c254_i32_98 dim 1 : vector<4x256xf32>, i32 -> vector<4x256xf32>
    %192 = arith.mulf %10, %191 : vector<4x256xf32>
    %c253_i32_99 = arith.constant 253 : i32
    %193 = tpu.dynamic_rotate %179 by %c253_i32_99 dim 1 : vector<4x256xf32>, i32 -> vector<4x256xf32>
    %194 = arith.mulf %10, %193 : vector<4x256xf32>
    %c252_i32_100 = arith.constant 252 : i32
    %195 = tpu.dynamic_rotate %179 by %c252_i32_100 dim 1 : vector<4x256xf32>, i32 -> vector<4x256xf32>
    %196 = arith.mulf %10, %195 : vector<4x256xf32>
    %197 = tpu.concatenate %181, %183, %185, %187, %188, %190, %192, %194, %196 in 0 : vector<4x256xf32>, vector<4x256xf32>, vector<4x256xf32>, vector<4x256xf32>, vector<4x256xf32>, vector<4x256xf32>, vector<4x256xf32>, vector<4x256xf32>, vector<4x256xf32> -> vector<36x256xf32>
    %c0_101 = arith.constant 0 : index
    %c0_102 = arith.constant 0 : index
    %198 = vector.load %arg5[%c0_101, %c0_102] : memref<9x36xf32, #tpu.memory_space<vmem>>, vector<9x36xf32>
    %cst_103 = arith.constant dense<0.000000e+00> : vector<9x256xf32>
    %199 = tpu.matmul %198, %197, %cst_103 {dimension_numbers = #tpu.dot_dimension_numbers<[1], [0], [0], [1], [0, 0, 1, 1], [], []>} : vector<9x36xf32>, vector<36x256xf32>, vector<9x256xf32> -> vector<9x256xf32>
    %c7 = arith.constant 7 : index
    %c0_104 = arith.constant 0 : index
    %c0_105 = arith.constant 0 : index
    %200 = vector.load %arg6[%c7, %c0_104, %c0_105] : memref<9x9x256xf32, #tpu.memory_space<vmem>>, vector<1x9x256xf32>
    %201 = vector.shape_cast %200 : vector<1x9x256xf32> to vector<9x256xf32>
    %202 = arith.mulf %199, %201 : vector<9x256xf32>
    %c192_i32 = arith.constant 192 : i32
    %203 = tpu.dynamic_rotate %11 by %c192_i32 dim 1 : vector<4x256xf32>, i32 -> vector<4x256xf32>
    %c4_i32_106 = arith.constant 4 : i32
    %204 = tpu.dynamic_rotate %203 by %c4_i32_106 dim 1 : vector<4x256xf32>, i32 -> vector<4x256xf32>
    %205 = arith.mulf %10, %204 : vector<4x256xf32>
    %c3_i32_107 = arith.constant 3 : i32
    %206 = tpu.dynamic_rotate %203 by %c3_i32_107 dim 1 : vector<4x256xf32>, i32 -> vector<4x256xf32>
    %207 = arith.mulf %10, %206 : vector<4x256xf32>
    %c2_i32_108 = arith.constant 2 : i32
    %208 = tpu.dynamic_rotate %203 by %c2_i32_108 dim 1 : vector<4x256xf32>, i32 -> vector<4x256xf32>
    %209 = arith.mulf %10, %208 : vector<4x256xf32>
    %c1_i32_109 = arith.constant 1 : i32
    %210 = tpu.dynamic_rotate %203 by %c1_i32_109 dim 1 : vector<4x256xf32>, i32 -> vector<4x256xf32>
    %211 = arith.mulf %10, %210 : vector<4x256xf32>
    %212 = arith.mulf %10, %203 : vector<4x256xf32>
    %c255_i32_110 = arith.constant 255 : i32
    %213 = tpu.dynamic_rotate %203 by %c255_i32_110 dim 1 : vector<4x256xf32>, i32 -> vector<4x256xf32>
    %214 = arith.mulf %10, %213 : vector<4x256xf32>
    %c254_i32_111 = arith.constant 254 : i32
    %215 = tpu.dynamic_rotate %203 by %c254_i32_111 dim 1 : vector<4x256xf32>, i32 -> vector<4x256xf32>
    %216 = arith.mulf %10, %215 : vector<4x256xf32>
    %c253_i32_112 = arith.constant 253 : i32
    %217 = tpu.dynamic_rotate %203 by %c253_i32_112 dim 1 : vector<4x256xf32>, i32 -> vector<4x256xf32>
    %218 = arith.mulf %10, %217 : vector<4x256xf32>
    %c252_i32_113 = arith.constant 252 : i32
    %219 = tpu.dynamic_rotate %203 by %c252_i32_113 dim 1 : vector<4x256xf32>, i32 -> vector<4x256xf32>
    %220 = arith.mulf %10, %219 : vector<4x256xf32>
    %221 = tpu.concatenate %205, %207, %209, %211, %212, %214, %216, %218, %220 in 0 : vector<4x256xf32>, vector<4x256xf32>, vector<4x256xf32>, vector<4x256xf32>, vector<4x256xf32>, vector<4x256xf32>, vector<4x256xf32>, vector<4x256xf32>, vector<4x256xf32> -> vector<36x256xf32>
    %c0_114 = arith.constant 0 : index
    %c0_115 = arith.constant 0 : index
    %222 = vector.load %arg5[%c0_114, %c0_115] : memref<9x36xf32, #tpu.memory_space<vmem>>, vector<9x36xf32>
    %cst_116 = arith.constant dense<0.000000e+00> : vector<9x256xf32>
    %223 = tpu.matmul %222, %221, %cst_116 {dimension_numbers = #tpu.dot_dimension_numbers<[1], [0], [0], [1], [0, 0, 1, 1], [], []>} : vector<9x36xf32>, vector<36x256xf32>, vector<9x256xf32> -> vector<9x256xf32>
    %c8 = arith.constant 8 : index
    %c0_117 = arith.constant 0 : index
    %c0_118 = arith.constant 0 : index
    %224 = vector.load %arg6[%c8, %c0_117, %c0_118] : memref<9x9x256xf32, #tpu.memory_space<vmem>>, vector<1x9x256xf32>
    %225 = vector.shape_cast %224 : vector<1x9x256xf32> to vector<9x256xf32>
    %226 = arith.mulf %223, %225 : vector<9x256xf32>
    %227 = tpu.concatenate %35, %59, %83, %107, %130, %154, %178, %202, %226 in 0 : vector<9x256xf32>, vector<9x256xf32>, vector<9x256xf32>, vector<9x256xf32>, vector<9x256xf32>, vector<9x256xf32>, vector<9x256xf32>, vector<9x256xf32>, vector<9x256xf32> -> vector<81x256xf32>
    %cst_119 = arith.constant dense<0xFF800000> : vector<256xf32>
    %228 = vector.multi_reduction <maximumf>, %227, %cst_119 [0] : vector<81x256xf32> to vector<256xf32>
    %229 = vector.shape_cast %228 : vector<256xf32> to vector<1x256xf32>
    %230 = vector.broadcast %229 : vector<1x256xf32> to vector<81x256xf32>
    %231 = arith.subf %227, %230 : vector<81x256xf32>
    %232 = math.exp %231 : vector<81x256xf32>
    %cst_120 = arith.constant dense<0.000000e+00> : vector<256xf32>
    %233 = vector.multi_reduction <add>, %232, %cst_120 [0] : vector<81x256xf32> to vector<256xf32>
    %234 = vector.shape_cast %233 : vector<256xf32> to vector<1x256xf32>
    %cst_121 = arith.constant 1.000000e+00 : f32
    %235 = vector.broadcast %cst_121 : f32 to vector<1x256xf32>
    %236 = arith.divf %235, %234 : vector<1x256xf32>
    %237 = vector.broadcast %236 : vector<1x256xf32> to vector<81x256xf32>
    %238 = arith.mulf %232, %237 : vector<81x256xf32>
    %c0_122 = arith.constant 0 : index
    %c0_123 = arith.constant 0 : index
    %c0_124 = arith.constant 0 : index
    %239 = vector.load %arg7[%c0_122, %c0_123, %c0_124] : memref<1x81x256xf32, #tpu.memory_space<vmem>>, vector<1x81x256xf32>
    %240 = vector.shape_cast %239 : vector<1x81x256xf32> to vector<81x256xf32>
    %241 = vector.shape_cast %238 : vector<81x256xf32> to vector<1x81x256xf32>
    tpu.vector_store %arg7[%c0_122, %c0_123, %c0_124], %241 {strides = array<i32>} : memref<1x81x256xf32, #tpu.memory_space<vmem>>, vector<1x81x256xf32>,
    return
  }
  func.func @transform_0(%arg0: i32) -> (i32, i32, i32) {
    %c0_i32 = arith.constant 0 : i32
    %c0_i32_0 = arith.constant 0 : i32
    %c0_i32_1 = arith.constant 0 : i32
    return %arg0, %c0_i32, %c0_i32_0 : i32, i32, i32
  }
  func.func @transform_1(%arg0: i32) -> (i32, i32, i32) {
    %c0_i32 = arith.constant 0 : i32
    %c0_i32_0 = arith.constant 0 : i32
    %c0_i32_1 = arith.constant 0 : i32
    return %arg0, %c0_i32, %c0_i32_0 : i32, i32, i32
  }
  func.func @transform_2(%arg0: i32) -> (i32, i32) {
    %c0_i32 = arith.constant 0 : i32
    %c0_i32_0 = arith.constant 0 : i32
    %c0_i32_1 = arith.constant 0 : i32
    return %c0_i32, %c0_i32_0 : i32, i32
  }
  func.func @transform_3(%arg0: i32) -> (i32, i32) {
    %c0_i32 = arith.constant 0 : i32
    %c0_i32_0 = arith.constant 0 : i32
    %c0_i32_1 = arith.constant 0 : i32
    return %c0_i32, %c0_i32_0 : i32, i32
  }
  func.func @transform_4(%arg0: i32) -> (i32, i32) {
    %c0_i32 = arith.constant 0 : i32
    %c0_i32_0 = arith.constant 0 : i32
    %c0_i32_1 = arith.constant 0 : i32
    return %c0_i32, %c0_i32_0 : i32, i32
  }
  func.func @transform_5(%arg0: i32) -> (i32, i32, i32) {
    %c0_i32 = arith.constant 0 : i32
    %c0_i32_0 = arith.constant 0 : i32
    %c0_i32_1 = arith.constant 0 : i32
    %c0_i32_2 = arith.constant 0 : i32
    return %c0_i32, %c0_i32_0, %c0_i32_1 : i32, i32, i32
  }
  func.func @transform_6(%arg0: i32) -> (i32, i32, i32) {
    %c0_i32 = arith.constant 0 : i32
    %c0_i32_0 = arith.constant 0 : i32
    %c0_i32_1 = arith.constant 0 : i32
    return %arg0, %c0_i32, %c0_i32_0 : i32, i32, i32
  }
}

</mosaic_0001>

<bundles_post_ra>
// kernel: tpu_custom_call.1
= control target key start
LH: loop header
LB: loop body
LE: loop exit
PB: predicated region body
PF: predicated region fallthrough
CT: control target
= control target key end

     0   :  { %11 = vsyncpa [#allocation3], 0  ;;  %s4478_s0 = inlined_call_operand.hbm [shape: f32[2,16,256], index: 0, kind: input, shape index: {}]   ;;  %s4479_s1 = inlined_call_operand.hbm [shape: f32[2,16,256], index: 1, kind: input, shape index: {}]   ;;  %s4480_s2 = inlined_call_operand.vmem [shape: f32[8,32], index: 2, kind: input, shape index: {}]   ;;  %s4481_s3 = inlined_call_operand.vmem [shape: f32[8,1], index: 3, kind: input, shape index: {}]   ;;  %s4482_s4 = inlined_call_operand.vmem [shape: f32[9,36], index: 4, kind: input, shape index: {}]   ;;  %s4483_s5 = inlined_call_operand.hbm [shape: f32[9,9,256], index: 5, kind: input, shape index: {}]   ;;  %s4484_s6 = inlined_call_operand.vmem [shape: f32[2,81,256], index: 6, kind: output, shape index: {}]  }
   0x1   :  { %13 = vsyncpa [#allocation3 + $0x1], 0 }
   0x2   :  { %14 = vsyncpa [#allocation5], 0 }
   0x3   :  { %16 = vsyncpa [#allocation5 + $0x1], 0  ;;  %s3000_s21 = smov 0   ;;  %s3002_s22 = smov 0  }
   0x4   :  { %s3004_s23 = smov 0   ;;  %s3006_s24 = smov 0  }
   0x5 LB: > { %s3019_s25 = sadd.s32 4294967295, %s2941_s24   ;;  %p42_p0 = scmp.ne.s32.totalorder %s2933_s22, %s2929_s21  ;;  %s2941_s24 = sphi %s3006_s24, %s4504_s24   ;;  %s2937_s23 = sphi %s3004_s23, %s4503_s23   ;;  %s2933_s22 = sphi %s3002_s22, %s4502_s22   ;;  %s2929_s21 = sphi %s3000_s21, %s4501_s21  }
   0x6   : > { %p4485_p1 = scmp.eq.s32.totalorder %s3019_s25, 0  ;;  %p2552_p2 = scmp.ge.s32.totalorder %s2941_s24, 1 }
   0x7   : > { %p189_p3 = scmp.lt.s32.totalorder %s2941_s24, 3  ;;  %s2943_s28 = smov [#allocation6]  }
   0x8   : > { %p3027_p4 = por %p4485_p1, %p42_p0  ;;  %s210_s29 = sshll.u32 %s2943_s28, 4  ;;  %s211_s29 = int_to_ptr.vmem [resolvable:$true] %s210_s29 }
   0x9   : > { %p3031_p5 = pnand %p2552_p2, %p189_p3  ;;  %s3044_s7 = sadd.s32 1, %s2941_s24  }
   0xa   : > { %s4490_s26 = scalar_select %p3027_p4, 1, 0 }
   0xb   : > { %s4491_s27 = scalar_select %p3031_p5, 1, 0 }
   0xc   : > { %p2696_p6 = pneg %p3031_p5  ;;  %s29_s8 = sadd.s32 1, %s2937_s23 }
   0xd   : > { %s26_s9 = ssub.s32 %s2941_s24, %s3044_s7  ;;  %s2811_s12 = scalar_lea.hbm %s4483_s5, 4608 }
   0xe   : > { %p3039_p7 = pnand %p2696_p6, %p4485_p1  ;;  %p2812_p8 = scmp.ne.s32.totalorder %s4483_s5, %s2811_s12 }
   0xf   : > { %p2818_p12 = scmp.lt.u32.totalorder %s2811_s12, %s4483_s5 }
  0x10   : > { %p2813_p9 = pneg %p3039_p7 }
  0x12   : > { %p2814_p10 = pnand %p2813_p9, %p2812_p8 }
  0x14   : > { %p2815_p11 = pneg %p2814_p10 }
  0x16   : > { %p2820_p13 = pnand %p2818_p12, %p2815_p11 }
  0x18   : > { %2823 = shalt.err (!%p2820_p13)
}
  0x19   : > { %s2824_s17 = scalar_lea.vmem %s211_s29, 4608  ;;  %p2832_p6 = scmp.lt.s32.totalorder %s211_s29, %s211_s29 }
  0x1a   : > { %p2825_p0 = scmp.ne.s32.totalorder %s211_s29, %s2824_s17  ;;  %p2833_p1 = scmp.lt.s32.totalorder %s2824_s17, %s2824_s17 }
  0x1c   : > { %p2827_p2 = pnand %p2825_p0, %p2813_p9  ;;  %p2834_p4 = por %p2833_p1, %p2832_p6 }
  0x1e   : > { %p2828_p3 = pneg %p2827_p2 }
  0x20   : > { %p2835_p5 = pnand %p2834_p4, %p2828_p3 }
  0x22   : > { %2838 = shalt.err (!%p2835_p5)
}
  0x23   : > { %s4488_s18 = smov 256   ;;  %s2945_s19 = smov 16  }
  0x24   : > { %2699 = dma.hbm_to_vmem [thread:$0]  (!%p3039_p7), %s4483_s5, 4608, %s211_s29, [#allocation5], %s4488_s18, %s4488_s18, %s2945_s19  }
  0x25   : > { %p27_p1 = scmp.eq.s32.totalorder %s26_s9, 0  ;;  %p36_p4 = scmp.ne.s32.totalorder %s2937_s23, %s2933_s22 }
  0x26   : > { %p37_p5 = scmp.eq.s32.totalorder %s2941_s24, 0  ;;  %p2708_p8 = scmp.lt.s32.totalorder %s2941_s24, 2 }
  0x27   : > { %s3073_s28 = scalar_select %p27_p1, %s2937_s23, %s29_s8  }
  0x28   : > { %p38_p9 = por %p37_p5, %p36_p4  ;;  %s224_s10 = sand.u32 1, %s2937_s23  }
  0x29   : > { %s2555_s11 = sshll.u32 %s224_s10, 5  ;;  %s2605_s12 = sshll.u32 %s2941_s24, 9 }
  0x2a   : > { %s3080_s30 = scalar_lea.hbm %s4478_s0, %s2605_s12  ;;  %s228_s15 = scalar_lea.vmem [#allocation2], %s2555_s11 }
  0x2b   : > { %s235_s29 = sshll.u32 %s228_s15, 4  ;;  %p3084_p7 = pnand %p2708_p8, %p38_p9  ;;  %s3082_s29 = int_to_ptr.vmem [resolvable:$true] %s235_s29 }
  0x2c   : > { %s3091_s17 = scalar_lea.hbm %s4479_s1, %s2605_s12  ;;  %s249_s20 = scalar_lea.vmem [#allocation4], %s2555_s11 }
  0x2d   : > { %s3093_s21 = sshll.u32 %s249_s20, 4  ;;  %s3095_s13 = scalar_lea.sflag [#allocation3], %s224_s10  ;;  %s3127_s21 = int_to_ptr.vmem [resolvable:$true] %s3093_s21 }
  0x2e   : > { %s2839_s14 = scalar_lea.hbm %s3080_s30, 512  ;;  %p2841_p11 = pneg %p3084_p7 }
  0x2f   : > { %p2840_p10 = scmp.ne.s32.totalorder %s3080_s30, %s2839_s14  ;;  %s2844_s9 = scalar_lea.hbm %s4478_s0, 1024 }
  0x30   : > { %p2845_p0 = scmp.lt.u32.totalorder %s3080_s30, %s4478_s0  ;;  %p2846_p2 = scmp.lt.u32.totalorder %s2844_s9, %s2839_s14 }
  0x31   : > { %p2842_p12 = pnand %p2841_p11, %p2840_p10  ;;  %p2848_p6 = scmp.lt.u32.totalorder %s2839_s14, %s3080_s30 }
  0x32   : > { %p2847_p3 = por %p2846_p2, %p2845_p0 }
  0x33   : > { %p2843_p13 = pneg %p2842_p12 }
  0x34   : > { %p2849_p1 = por %p2848_p6, %p2847_p3 }
  0x36   : > { %p2850_p4 = pnand %p2849_p1, %p2843_p13 }
  0x38   : > { %2853 = shalt.err (!%p2850_p4)
}
  0x39   : > { %s2854_s10 = scalar_lea.vmem %s3082_s29, 512  ;;  %s2946_s18 = smov [#allocation2]  }
  0x3a   : > { %p2855_p5 = scmp.ne.s32.totalorder %s3082_s29, %s2854_s10  ;;  %s2859_s11 = sshll.u32 %s2946_s18, 4  ;;  %s2860_s11 = int_to_ptr.vmem [resolvable:$false] %s2859_s11 }
  0x3b   : > { %s2861_s20 = scalar_lea.vmem %s2860_s11, 1024  ;;  %p2862_p10 = scmp.lt.s32.totalorder %s3082_s29, %s2860_s11 }
  0x3c   : > { %p2857_p8 = pnand %p2855_p5, %p2841_p11  ;;  %p2863_p12 = scmp.lt.s32.totalorder %s2861_s20, %s2854_s10 }
  0x3e   : > { %p2858_p9 = pneg %p2857_p8  ;;  %p2864_p0 = por %p2863_p12, %p2862_p10 }
  0x40   : > { %p2865_p2 = pnand %p2864_p0, %p2858_p9 }
  0x42   : > { %2868 = shalt.err (!%p2865_p2)
}
  0x43   : > { %s4494_s14 = smov 256   ;;  %s245_s15 = sand.u32 1, %s2941_s24  }
  0x44   : > { %2703 = dma.hbm_to_vmem [thread:$0]  (!%p3084_p7), %s3080_s30, 512, %s3082_s29, %s3095_s13, %s4494_s14, %s4494_s14, %s2945_s19  }
  0x45   : > { %s3130_s9 = scalar_lea.sflag [#allocation5], %s245_s15  ;;  %s2869_s16 = scalar_lea.hbm %s3091_s17, 512 }
  0x46   : > { %p2870_p13 = scmp.ne.s32.totalorder %s3091_s17, %s2869_s16  ;;  %s2874_s18 = scalar_lea.hbm %s4479_s1, 1024 }
  0x47   : > { %p2875_p1 = scmp.lt.u32.totalorder %s3091_s17, %s4479_s1  ;;  %p2876_p4 = scmp.lt.u32.totalorder %s2874_s18, %s2869_s16 }
  0x48   : > { %p2872_p3 = pnand %p2870_p13, %p2841_p11  ;;  %p2878_p8 = scmp.lt.u32.totalorder %s2869_s16, %s3091_s17 }
  0x49   : > { %p2877_p5 = por %p2876_p4, %p2875_p1 }
  0x4a   : > { %p2873_p6 = pneg %p2872_p3 }
  0x4b   : > { %p2879_p9 = por %p2878_p8, %p2877_p5 }
  0x4d   : > { %p2880_p10 = pnand %p2879_p9, %p2873_p6 }
  0x4f   : > { %2883 = shalt.err (!%p2880_p10)
}
  0x50   : > { %s2884_s24 = scalar_lea.vmem %s3127_s21, 512  ;;  %s2947_s30 = smov [#allocation4]  }
  0x51   : > { %p2885_p12 = scmp.ne.s32.totalorder %s3127_s21, %s2884_s24  ;;  %s2889_s29 = sshll.u32 %s2947_s30, 4  ;;  %s2890_s29 = int_to_ptr.vmem [resolvable:$false] %s2889_s29 }
  0x52   : > { %s2891_s13 = scalar_lea.vmem %s2890_s29, 1024  ;;  %p2892_p13 = scmp.lt.s32.totalorder %s3127_s21, %s2890_s29 }
  0x53   : > { %p2887_p0 = pnand %p2885_p12, %p2841_p11  ;;  %p2893_p3 = scmp.lt.s32.totalorder %s2891_s13, %s2884_s24 }
  0x55   : > { %p2888_p2 = pneg %p2887_p0  ;;  %p2894_p1 = por %p2893_p3, %p2892_p13 }
  0x57   : > { %p2895_p4 = pnand %p2894_p1, %p2888_p2 }
  0x59   : > { %2898 = shalt.err (!%p2895_p4)
}
  0x5a   : > { %2706 = dma.hbm_to_vmem [thread:$0]  (!%p3084_p7), %s3091_s17, 512, %s3127_s21, %s3130_s9, %s4494_s14, %s4494_s14, %s2945_s19  }
  0x5b   : > { %p4495_p11 = scmp.ne.s32.totalorder %s4491_s27, 0 }
  0x5c   : > { %s270_s15 = sand.u32 (!%p4495_p11), 1, %s2933_s22   ;;  %p4496_p6 = scmp.ne.s32.totalorder (!%p4495_p11), %s4490_s26, 0 }
  0x5d   : > { %268 = sbr.rel (%p4495_p11) target bundleno = 1163 (0x48b), region = 44  ;;  %s2562_s16 = sshll.u32 (!%p4495_p11), %s270_s15, 5 }
  0x5e   : > { %s271_s12 = scalar_lea.sflag (!%p4495_p11), [#allocation3], %s270_s15  ;;  %s274_s10 = scalar_lea.vmem (!%p4495_p11), [#allocation2], %s2562_s16 }
  0x64   : > { %2916 = dma.done.wait (%p4496_p6), %s271_s12, 512  }
  0x65   : > { %2918 = vsyncadd (%p4496_p6), %s271_s12, 4294966784  ;;  %s279_s8 = sand.u32 1, %s3019_s25   ;;  %s283_s11 = scalar_lea.vmem [#allocation4], %s2562_s16 }
  0x66   : > { %s280_s18 = scalar_lea.sflag [#allocation5], %s279_s8 }
  0x67   : > { %2920 = dma.done.wait (%p4496_p6), %s280_s18, 512  }
  0x68   : > { %2922 = vsyncadd (%p4496_p6), %s280_s18, 4294966784  ;;  %p4497_p7 = scmp.eq.s32.totalorder %s3019_s25, 0 }
  0x6a   : > { %2924 = dma.done.wait (%p4497_p7), [#allocation5], 4608   ;;  %p4498_p5 = pmov %p4497_p7 }
  0x6b   : > { %v2948_v0 = vmov 0.0   ;;  %v2949_v1 = vmov 0   ;;  %v327_v2 = vld [vmem:[%s274_s10 + $0x8] sm:$0xff]  ;;  %v329_v3 = vld [vmem:[%s274_s10 + $0x18] sm:$0xff]  ;;  %v326_v4 = vld [vmem:[%s274_s10] sm:$0xff]  ;;  %vm341_vm0 = vcmask 261120   ;;  %v426_v35 = vlaneseq }
  0x6c   : > { %2926 = vsyncadd (%p4498_p5), [#allocation5], 4294962688  ;;  %409 = vmatprep.mubr.f32.mxu0 %v2948_v0  ;;  %2762 = vset.pattern.permute.xlu0 %v2949_v1  ;;  %v2607_v5 = vpack.c.bf16 %v329_v3, %v327_v2  ;;  %v328_v6 = vld [vmem:[%s274_s10 + $0x10] sm:$0xff]  ;;  %v331_v7 = vld [vmem:[%s283_s11 + $0x8] sm:$0xff]  ;;  %s2950_s21 = smov 48   ;;  %s2951_s14 = smov 64  }
  0x6d   : > { %617 = vmatprep.mubr.f32.mxu1 %v2948_v0  ;;  %v333_v8 = vld [vmem:[%s283_s11 + $0x18] sm:$0xff]  ;;  %v2609_v9 = vpack.c.bf16 %v328_v6, %v326_v4  ;;  %v330_v11 = vld [vmem:[%s283_s11] sm:$0xff]  ;;  %v332_v12 = vld [vmem:[%s283_s11 + $0x10] sm:$0xff]  ;;  %s2952_s9 = smov 32   ;;  %s2953_s20 = smov 16   ;;  %v3264_v37 = vand.u32 127, %v426_v35 }
  0x6e   : > { %v2611_v10 = vpack.c.bf16 %v333_v8, %v331_v7  ;;  %2608 = vmatprep.subr.bf16.mxu0 %v2607_v5  ;;  %v335_v13 = vld [vmem:[%s4481_s3] sm:$0xff]  ;;  %v2613_v14 = vpack.c.bf16 %v332_v12, %v330_v11  ;;  %s2954_s24 = smov 112   ;;  %s2955_s30 = smov 96   ;;  %vm529_vm10 = vcmask 1043456  }
  0x6f   : > { %2610 = vmatpush1.bf16.msra.mxu0 %v2609_v9  ;;  %338 = vperm.xlu0 %2762, %v335_v13   ;;  %v334_v15 = vld [vmem:[%s4480_s2] sm:$0xff]  ;;  %s2956_s29 = smov 80   ;;  %s2957_s13 = smov 3   ;;  %vm428_vm1 = vcmp.lt.s32.totalorder %v3264_v37, 64  ;;  %vm642_vm2 = vcmp.lt.s32.totalorder %v3264_v37, 48  ;;  %vm839_vm3 = vcmp.lt.s32.totalorder %v3264_v37, 32 }
  0x70   : > { %2612 = vmatprep.subr.bf16.mxu0 %v2611_v10  ;;  %s2958_s15 = smov 1   ;;  %s2959_s16 = smov 4   ;;  %vm1036_vm4 = vcmp.lt.s32.totalorder %v3264_v37, 16  ;;  %vm444_vm5 = vcmp.lt.s32.totalorder %v3264_v37, 3  ;;  %vm462_vm6 = vcmp.lt.s32.totalorder %v3264_v37, 1  ;;  %vm1423_vm7 = vcmp.lt.s32.totalorder %v3264_v37, 112 }
  0x71   : > { %s2960_s12 = smov 2   ;;  %s2961_s10 = smov 127   ;;  %vm435_vm8 = vcmp.lt.s32.totalorder %v3264_v37, 4  ;;  %vm453_vm9 = vcmp.lt.s32.totalorder %v3264_v37, 2  ;;  %vm473_vm11 = vcmp.lt.s32.totalorder %v3264_v37, 127  ;;  %vm491_vm12 = vcmp.lt.s32.totalorder %v3264_v37, 125 }
  0x72   : > { %s2962_s8 = smov 125   ;;  %s2963_s18 = smov 126   ;;  %vm482_vm13 = vcmp.lt.s32.totalorder %v3264_v37, 126  ;;  %vm1620_vm14 = vcmp.lt.s32.totalorder %v3264_v37, 96  ;;  %vm1817_vm15 = vcmp.lt.s32.totalorder %v3264_v37, 80 }
  0x73   : > { %2614 = vmatpush1.bf16.msra.mxu0 %v2613_v14  ;;  %s2964_s11 = smov 124   ;;  %p321_p8 = scmp.lt.s32.totalorder %s3019_s25, 1 }
  0x75   : > { %s4506_s25 = smov (!%p321_p8, %s3019_s25), 1 }
  0x76   : > { %2566 = vmatmul.mubr.msk.f32.vlgmr.msra.gmra.mrb[0].mxu0 %vm341_vm0, %v334_v15  ;;  %vm500_vm0 = vcmp.lt.s32.totalorder %v3264_v37, 124 }
  0x77   : > { %813 = vmatprep.mubr.f32.mxu0 %v2948_v0 }
  0xee   : > { %v339_v16 = vpop.permute.xlu0 %338 }
 0x149   : > { %v411_v17 = vpop.f32.mrb[0].mxu0 }
 0x14a   : > { %v3184_v18 = vadd.f32 %v411_v17, %v339_v16  ;;  %v413_v19 = vpop.f32.mrb[1].mxu0 }
 0x14b   : > { %v3186_v20 = vadd.f32 %v413_v19, %v339_v16 }
 0x14c   : > { %v3189_v21 = vrot.slane %v3184_v18, 4 }
 0x14d   : > { %v3195_v22 = vrot.slane %v3186_v20, 4 }
 0x14e   : > { %638 = vrot.lane.b32.xlu1 %v3189_v21, %s2950_s21  ;;  %422 = vrot.lane.b32.xlu0 %v3189_v21, %s2951_s14 }
 0x152   : > { %835 = vrot.lane.b32.xlu1 %v3189_v21, %s2952_s9  ;;  %640 = vrot.lane.b32.xlu0 %v3195_v22, %s2950_s21  ;;  %s2687_s21 = smul.u32 176, %s4506_s25 }
 0x156   : > { %1032 = vrot.lane.b32.xlu1 %v3189_v21, %s2953_s20  ;;  %837 = vrot.lane.b32.xlu0 %v3195_v22, %s2952_s9 }
 0x15a   : > { %1419 = vrot.lane.b32.xlu1 %v3189_v21, %s2954_s24  ;;  %1034 = vrot.lane.b32.xlu0 %v3195_v22, %s2953_s20  ;;  %s4428_s20 = scalar_lea.vmem %s4484_s6, %s2687_s21 }
 0x15e   : > { %1616 = vrot.lane.b32.xlu1 %v3189_v21, %s2955_s30  ;;  %1421 = vrot.lane.b32.xlu0 %v3195_v22, %s2954_s24 }
 0x162   : > { %1813 = vrot.lane.b32.xlu1 %v3189_v21, %s2956_s29  ;;  %1618 = vrot.lane.b32.xlu0 %v3195_v22, %s2955_s30 }
 0x166   : > { %1237 = vrot.lane.b32.xlu1 %v3189_v21, %s2957_s13  ;;  %1815 = vrot.lane.b32.xlu0 %v3195_v22, %s2956_s29 }
 0x16a   : > { %1253 = vrot.lane.b32.xlu1 %v3189_v21, %s2958_s15  ;;  %1239 = vrot.lane.b32.xlu0 %v3195_v22, %s2957_s13 }
 0x16e   : > { %1229 = vrot.lane.b32.xlu1 %v3189_v21, %s2959_s16  ;;  %1255 = vrot.lane.b32.xlu0 %v3195_v22, %s2958_s15 }
 0x172   : > { %1245 = vrot.lane.b32.xlu1 %v3189_v21, %s2960_s12  ;;  %1231 = vrot.lane.b32.xlu0 %v3195_v22, %s2959_s16 }
 0x176   : > { %1263 = vrot.lane.b32.xlu1 %v3189_v21, %s2961_s10  ;;  %1247 = vrot.lane.b32.xlu0 %v3195_v22, %s2960_s12 }
 0x17a   : > { %1279 = vrot.lane.b32.xlu1 %v3189_v21, %s2962_s8  ;;  %1265 = vrot.lane.b32.xlu0 %v3195_v22, %s2961_s10 }
 0x17e   : > { %1271 = vrot.lane.b32.xlu1 %v3189_v21, %s2963_s18  ;;  %1281 = vrot.lane.b32.xlu0 %v3195_v22, %s2962_s8 }
 0x182   : > { %1287 = vrot.lane.b32.xlu1 %v3189_v21, %s2964_s11  ;;  %1273 = vrot.lane.b32.xlu0 %v3195_v22, %s2963_s18 }
 0x186   : > { %424 = vrot.lane.b32.xlu1 %v3195_v22, %s2951_s14  ;;  %1289 = vrot.lane.b32.xlu0 %v3195_v22, %s2964_s11 }
 0x1c0   : > { %v639_v23 = vpop.permute.xlu1 %638  ;;  %v423_v39 = vpop.permute.xlu0 %422 }
 0x1c4   : > { %v836_v24 = vpop.permute.xlu1 %835  ;;  %v641_v43 = vpop.permute.xlu0 %640 }
 0x1c5   : > { %v3302_v44 = vsel %vm642_vm2, %v639_v23, %v641_v43  ;;  %v3304_v45 = vsel %vm642_vm2, %v641_v43, %v639_v23  ;;  %vm2156_vm2 = vcmask 1040384  }
 0x1c8   : > { %v3242_v25 = vpop.permute.xlu1 %1032  ;;  %v838_v46 = vpop.permute.xlu0 %837 }
 0x1c9   : > { %v3333_v49 = vsel %vm839_vm3, %v836_v24, %v838_v46  ;;  %v3335_v50 = vsel %vm839_vm3, %v838_v46, %v836_v24  ;;  %vm2171_vm3 = vcmask 1041408  }
 0x1cc   : > { %v3244_v26 = vpop.permute.xlu1 %1419  ;;  %v1035_v47 = vpop.permute.xlu0 %1034 }
 0x1cd   : > { %v3387_v57 = vsel %vm1036_vm4, %v3242_v25, %v1035_v47  ;;  %v3390_v58 = vsel %vm1036_vm4, %v1035_v47, %v3242_v25  ;;  %vm2186_vm4 = vcmask 1042432  }
 0x1d0   : > { %v3246_v27 = vpop.permute.xlu1 %1616  ;;  %v3331_v48 = vpop.permute.xlu0 %1421 }
 0x1d1   : > { %v3455_v12 = vsel %vm1423_vm7, %v3244_v26, %v3331_v48  ;;  %v3459_v13 = vsel %vm1423_vm7, %v3331_v48, %v3244_v26  ;;  %vm2245_vm7 = vcmask 1046528  }
 0x1d4   : > { %v3248_v28 = vpop.permute.xlu1 %1813  ;;  %v3341_v51 = vpop.permute.xlu0 %1618 }
 0x1d8   : > { %v3250_v29 = vpop.permute.xlu1 %1237  ;;  %v3351_v52 = vpop.permute.xlu0 %1815 }
 0x1dc   : > { %v3252_v30 = vpop.permute.xlu1 %1253  ;;  %v3357_v53 = vpop.permute.xlu0 %1239 }
 0x1e0   : > { %v3254_v31 = vpop.permute.xlu1 %1229  ;;  %v3367_v54 = vpop.permute.xlu0 %1255 }
 0x1e4   : > { %v3256_v32 = vpop.permute.xlu1 %1245  ;;  %v3373_v55 = vpop.permute.xlu0 %1231 }
 0x1e8   : > { %v3258_v33 = vpop.permute.xlu1 %1263  ;;  %v3384_v56 = vpop.permute.xlu0 %1247 }
 0x1ec   : > { %v3260_v34 = vpop.permute.xlu1 %1279  ;;  %v3396_v59 = vpop.permute.xlu0 %1265 }
 0x1f0   : > { %v3262_v36 = vpop.permute.xlu1 %1271  ;;  %v3406_v60 = vpop.permute.xlu0 %1281 }
 0x1f4   : > { %v3266_v38 = vpop.permute.xlu1 %1287  ;;  %v3412_v61 = vpop.permute.xlu0 %1273 }
 0x1f8   : > { %v425_v40 = vpop.permute.xlu1 %424  ;;  %v3422_v62 = vpop.permute.xlu0 %1289 }
 0x1f9   : > { %v3269_v41 = vsel %vm428_vm1, %v423_v39, %v425_v40  ;;  %v3271_v42 = vsel %vm428_vm1, %v425_v40, %v423_v39  ;;  %vm540_vm1 = vcmask 293888  }
 0x1fa   : > { %440 = vrot.lane.b32.xlu1 %v3271_v42, %s2957_s13  ;;  %442 = vrot.lane.b32.xlu0 %v3269_v41, %s2957_s13 }
 0x1fe   : > { %458 = vrot.lane.b32.xlu1 %v3271_v42, %s2958_s15  ;;  %460 = vrot.lane.b32.xlu0 %v3269_v41, %s2958_s15 }
 0x202   : > { %431 = vrot.lane.b32.xlu1 %v3271_v42, %s2959_s16  ;;  %433 = vrot.lane.b32.xlu0 %v3269_v41, %s2959_s16 }
 0x206   : > { %449 = vrot.lane.b32.xlu1 %v3271_v42, %s2960_s12  ;;  %451 = vrot.lane.b32.xlu0 %v3269_v41, %s2960_s12 }
 0x20a   : > { %469 = vrot.lane.b32.xlu1 %v3271_v42, %s2961_s10  ;;  %471 = vrot.lane.b32.xlu0 %v3269_v41, %s2961_s10 }
 0x20e   : > { %487 = vrot.lane.b32.xlu1 %v3271_v42, %s2962_s8  ;;  %489 = vrot.lane.b32.xlu0 %v3269_v41, %s2962_s8 }
 0x212   : > { %478 = vrot.lane.b32.xlu1 %v3271_v42, %s2963_s18  ;;  %480 = vrot.lane.b32.xlu0 %v3269_v41, %s2963_s18 }
 0x216   : > { %653 = vrot.lane.b32.xlu1 %v3304_v45, %s2957_s13  ;;  %655 = vrot.lane.b32.xlu0 %v3302_v44, %s2957_s13 }
 0x21a   : > { %669 = vrot.lane.b32.xlu1 %v3304_v45, %s2958_s15  ;;  %671 = vrot.lane.b32.xlu0 %v3302_v44, %s2958_s15 }
 0x21e   : > { %645 = vrot.lane.b32.xlu1 %v3304_v45, %s2959_s16  ;;  %647 = vrot.lane.b32.xlu0 %v3302_v44, %s2959_s16 }
 0x222   : > { %661 = vrot.lane.b32.xlu1 %v3304_v45, %s2960_s12  ;;  %663 = vrot.lane.b32.xlu0 %v3302_v44, %s2960_s12 }
 0x226   : > { %679 = vrot.lane.b32.xlu1 %v3304_v45, %s2961_s10  ;;  %681 = vrot.lane.b32.xlu0 %v3302_v44, %s2961_s10 }
 0x22a   : > { %695 = vrot.lane.b32.xlu1 %v3304_v45, %s2962_s8  ;;  %697 = vrot.lane.b32.xlu0 %v3302_v44, %s2962_s8 }
 0x22e   : > { %850 = vrot.lane.b32.xlu1 %v3335_v50, %s2957_s13  ;;  %852 = vrot.lane.b32.xlu0 %v3333_v49, %s2957_s13 }
 0x232   : > { %866 = vrot.lane.b32.xlu1 %v3335_v50, %s2958_s15  ;;  %868 = vrot.lane.b32.xlu0 %v3333_v49, %s2958_s15 }
 0x236   : > { %687 = vrot.lane.b32.xlu1 %v3304_v45, %s2963_s18  ;;  %689 = vrot.lane.b32.xlu0 %v3302_v44, %s2963_s18 }
 0x23a   : > { %842 = vrot.lane.b32.xlu1 %v3335_v50, %s2959_s16  ;;  %844 = vrot.lane.b32.xlu0 %v3333_v49, %s2959_s16 }
 0x23e   : > { %858 = vrot.lane.b32.xlu1 %v3335_v50, %s2960_s12  ;;  %860 = vrot.lane.b32.xlu0 %v3333_v49, %s2960_s12 }
 0x242   : > { %496 = vrot.lane.b32.xlu1 %v3271_v42, %s2964_s11  ;;  %498 = vrot.lane.b32.xlu0 %v3269_v41, %s2964_s11 }
 0x246   : > { %876 = vrot.lane.b32.xlu1 %v3335_v50, %s2961_s10  ;;  %878 = vrot.lane.b32.xlu0 %v3333_v49, %s2961_s10 }
 0x24a   : > { %892 = vrot.lane.b32.xlu1 %v3335_v50, %s2962_s8  ;;  %894 = vrot.lane.b32.xlu0 %v3333_v49, %s2962_s8 }
 0x24e   : > { %884 = vrot.lane.b32.xlu1 %v3335_v50, %s2963_s18  ;;  %886 = vrot.lane.b32.xlu0 %v3333_v49, %s2963_s18 }
 0x252   : > { %1047 = vrot.lane.b32.xlu1 %v3390_v58, %s2957_s13  ;;  %1049 = vrot.lane.b32.xlu0 %v3387_v57, %s2957_s13 }
 0x256   : > { %1063 = vrot.lane.b32.xlu1 %v3390_v58, %s2958_s15  ;;  %1065 = vrot.lane.b32.xlu0 %v3387_v57, %s2958_s15 }
 0x25a   : > { %1039 = vrot.lane.b32.xlu1 %v3390_v58, %s2959_s16  ;;  %1041 = vrot.lane.b32.xlu0 %v3387_v57, %s2959_s16 }
 0x25e   : > { %1055 = vrot.lane.b32.xlu1 %v3390_v58, %s2960_s12  ;;  %1057 = vrot.lane.b32.xlu0 %v3387_v57, %s2960_s12 }
 0x262   : > { %703 = vrot.lane.b32.xlu1 %v3304_v45, %s2964_s11  ;;  %705 = vrot.lane.b32.xlu0 %v3302_v44, %s2964_s11 }
 0x266   : > { %1073 = vrot.lane.b32.xlu1 %v3390_v58, %s2961_s10  ;;  %1075 = vrot.lane.b32.xlu0 %v3387_v57, %s2961_s10 }
 0x26a   : > { %1089 = vrot.lane.b32.xlu1 %v3390_v58, %s2962_s8  ;;  %1091 = vrot.lane.b32.xlu0 %v3387_v57, %s2962_s8 }
 0x26c   : > { %v441_v63 = vpop.permute.xlu1 %440  ;;  %v443_v1 = vpop.permute.xlu0 %442 }
 0x26d   : > { %v445_v2 = vsel %vm444_vm5, %v441_v63, %v443_v1  ;;  %v446_v3 = vsel %vm444_vm5, %v443_v1, %v441_v63 }
 0x26e   : > { %1081 = vrot.lane.b32.xlu1 %v3390_v58, %s2963_s18  ;;  %1083 = vrot.lane.b32.xlu0 %v3387_v57, %s2963_s18  ;;  %v2012_v8 = vmul.f32 %v445_v2, %v3184_v18  ;;  %v2013_v9 = vmul.f32 %v446_v3, %v3186_v20  ;;  %v447_v10 = vmul.f32 %v446_v3, %v3184_v18 }
 0x26f   : > { %v448_v11 = vmul.f32 %v445_v2, %v3186_v20 }
 0x270   : > { %v459_v4 = vpop.permute.xlu1 %458  ;;  %v461_v5 = vpop.permute.xlu0 %460  ;;  %v2030_v35 = vrot.slane %v2012_v8, 4  ;;  %v2031_v39 = vrot.slane %v2013_v9, 4  ;;  %v507_v43 = vrot.slane %v447_v10, 4 }
 0x271   : > { %v463_v6 = vsel %vm462_vm6, %v459_v4, %v461_v5  ;;  %v464_v7 = vsel %vm462_vm6, %v461_v5, %v459_v4  ;;  %v508_v46 = vrot.slane %v448_v11, 4 }
 0x272   : > { %900 = vrot.lane.b32.xlu1 %v3335_v50, %s2964_s11  ;;  %902 = vrot.lane.b32.xlu0 %v3333_v49, %s2964_s11  ;;  %v465_v14 = vmul.f32 %v464_v7, %v3184_v18  ;;  %v466_v15 = vmul.f32 %v463_v6, %v3186_v20  ;;  %v2016_v19 = vmul.f32 %v463_v6, %v3184_v18 }
 0x273   : > { %v2017_v23 = vmul.f32 %v464_v7, %v3186_v20 }
 0x274   : > { %v432_v16 = vpop.permute.xlu1 %431  ;;  %v434_v17 = vpop.permute.xlu0 %433  ;;  %v513_v63 = vrot.slane %v465_v14, 4  ;;  %v514_v1 = vrot.slane %v466_v15, 4  ;;  %v2036_v6 = vrot.slane %v2016_v19, 4 }
 0x275   : > { %v436_v24 = vsel %vm435_vm8, %v432_v16, %v434_v17  ;;  %v437_v25 = vsel %vm435_vm8, %v434_v17, %v432_v16  ;;  %v2037_v7 = vrot.slane %v2017_v23, 4 }
 0x276   : > { %v2010_v26 = vmul.f32 %v436_v24, %v3184_v18  ;;  %v2011_v40 = vmul.f32 %v437_v25, %v3186_v20  ;;  %1434 = vrot.lane.b32.xlu1 %v3455_v12, %s2957_s13  ;;  %v438_v47 = vmul.f32 %v437_v25, %v3184_v18  ;;  %v439_v48 = vmul.f32 %v436_v24, %v3186_v20 }
 0x277   : > { %1436 = vrot.lane.b32.xlu0 %v3459_v13, %s2957_s13 }
 0x278   : > { %v450_v2 = vpop.permute.xlu1 %449  ;;  %v452_v3 = vpop.permute.xlu0 %451  ;;  %v3478_v4 = vsel %vm529_vm10, %v2011_v40, %v2031_v39  ;;  %v3481_v5 = vsel %vm529_vm10, %v2010_v26, %v2030_v35  ;;  %v531_v16 = vsel %vm529_vm10, %v439_v48, %v508_v46  ;;  %v530_v17 = vsel %vm529_vm10, %v438_v47, %v507_v43 }
 0x279   : > { %v454_v8 = vsel %vm453_vm9, %v450_v2, %v452_v3  ;;  %v455_v9 = vsel %vm453_vm9, %v452_v3, %v450_v2 }
 0x27a   : > { %v456_v10 = vmul.f32 %v455_v9, %v3184_v18  ;;  %v457_v11 = vmul.f32 %v454_v8, %v3186_v20  ;;  %v2014_v14 = vmul.f32 %v454_v8, %v3184_v18  ;;  %v2015_v15 = vmul.f32 %v455_v9, %v3186_v20  ;;  %1450 = vrot.lane.b32.xlu1 %v3455_v12, %s2958_s15 }
 0x27b   : > { %1452 = vrot.lane.b32.xlu0 %v3459_v13, %s2958_s15 }
 0x27c   : > { %v470_v19 = vpop.permute.xlu1 %469  ;;  %v472_v23 = vpop.permute.xlu0 %471  ;;  %v533_v24 = vsel %vm529_vm10, %v457_v11, %v514_v1  ;;  %v532_v25 = vsel %vm529_vm10, %v456_v10, %v513_v63  ;;  %v3501_v35 = vsel %vm529_vm10, %v2015_v15, %v2037_v7  ;;  %v3504_v39 = vsel %vm529_vm10, %v2014_v14, %v2036_v6 }
 0x27d   : > { %v474_v26 = vsel %vm473_vm11, %v470_v19, %v472_v23  ;;  %v475_v40 = vsel %vm473_vm11, %v472_v23, %v470_v19  ;;  %v2615_v46 = vpack.c.bf16 %v533_v24, %v531_v16  ;;  %v2617_v43 = vpack.c.bf16 %v532_v25, %v530_v17 }
 0x27e   : > { %v476_v47 = vmul.f32 %v474_v26, %v3184_v18  ;;  %1426 = vrot.lane.b32.xlu1 %v3455_v12, %s2959_s16  ;;  %v477_v48 = vmul.f32 %v475_v40, %v3186_v20  ;;  %v2020_v2 = vmul.f32 %v475_v40, %v3184_v18  ;;  %v2021_v3 = vmul.f32 %v474_v26, %v3186_v20 }
 0x27f   : > { %1428 = vrot.lane.b32.xlu0 %v3459_v13, %s2959_s16  ;;  %2616 = vmatprep.subr.bf16.mxu1 %v2615_v46  ;;  %v468_v19 = vmul.f32 %v3269_v41, %v3186_v20  ;;  %v467_v23 = vmul.f32 %v3271_v42, %v3184_v18 }
 0x280   : > { %v488_v6 = vpop.permute.xlu1 %487  ;;  %2618 = vmatpush1.bf16.msra.mxu1 %v2617_v43  ;;  %v490_v7 = vpop.permute.xlu0 %489  ;;  %v519_v16 = vrot.slane %v476_v47, 4  ;;  %v520_v17 = vrot.slane %v477_v48, 4  ;;  %v2042_v24 = vrot.slane %v2020_v2, 4  ;;  %v2043_v25 = vrot.slane %v2021_v3, 4 }
 0x281   : > { %v492_v8 = vsel %vm491_vm12, %v488_v6, %v490_v7  ;;  %v493_v9 = vsel %vm491_vm12, %v490_v7, %v488_v6 }
 0x282   : > { %v494_v10 = vmul.f32 %v492_v8, %v3184_v18  ;;  %v495_v11 = vmul.f32 %v493_v9, %v3186_v20  ;;  %v2024_v14 = vmul.f32 %v493_v9, %v3184_v18  ;;  %v2025_v15 = vmul.f32 %v492_v8, %v3186_v20  ;;  %1442 = vrot.lane.b32.xlu1 %v3455_v12, %s2960_s12 }
 0x283   : > { %1444 = vrot.lane.b32.xlu0 %v3459_v13, %s2960_s12  ;;  %v535_v3 = vsel %vm529_vm10, %v468_v19, %v520_v17 }
 0x284   : > { %v525_v26 = vrot.slane %v494_v10, 4  ;;  %v526_v40 = vrot.slane %v495_v11, 4  ;;  %v479_v46 = vpop.permute.xlu1 %478  ;;  %v481_v43 = vpop.permute.xlu0 %480  ;;  %v2048_v6 = vrot.slane %v2024_v14, 4  ;;  %v2049_v7 = vrot.slane %v2025_v15, 4 }
 0x285   : > { %v483_v47 = vsel %vm482_vm13, %v479_v46, %v481_v43  ;;  %v484_v48 = vsel %vm482_vm13, %v481_v43, %v479_v46  ;;  %v534_v10 = vsel %vm529_vm10, %v467_v23, %v519_v16  ;;  %v2019_v11 = vmul.f32 %v3271_v42, %v3186_v20 }
 0x286   : > { %v485_v8 = vmul.f32 %v483_v47, %v3184_v18  ;;  %v486_v9 = vmul.f32 %v484_v48, %v3186_v20  ;;  %v2022_v1 = vmul.f32 %v484_v48, %v3184_v18  ;;  %v2023_v2 = vmul.f32 %v483_v47, %v3186_v20  ;;  %1097 = vrot.lane.b32.xlu1 %v3390_v58, %s2964_s11 }
 0x287   : > { %1099 = vrot.lane.b32.xlu0 %v3387_v57, %s2964_s11  ;;  %v2018_v14 = vmul.f32 %v3269_v41, %v3184_v18  ;;  %v3567_v19 = vsel %vm529_vm10, %v2019_v11, %v2043_v25 }
 0x288   : > { %v654_v15 = vpop.permute.xlu1 %653  ;;  %v656_v46 = vpop.permute.xlu0 %655  ;;  %v537_v43 = vsel %vm529_vm10, %v486_v9, %v526_v40  ;;  %v536_v47 = vsel %vm529_vm10, %v485_v8, %v525_v26  ;;  %v3561_v48 = vsel %vm529_vm10, %v2023_v2, %v2049_v7  ;;  %v3564_v63 = vsel %vm529_vm10, %v2022_v1, %v2048_v6 }
 0x289   : > { %v2619_v17 = vpack.c.bf16 %v537_v43, %v535_v3  ;;  %v2621_v16 = vpack.c.bf16 %v536_v47, %v534_v10  ;;  %v3570_v42 = vsel %vm529_vm10, %v2018_v14, %v2042_v24  ;;  %v2683_v41 = vpack.c.bf16 %v3561_v48, %v3567_v19  ;;  %v632_v48 = vld [vmem:[#allocation6 + $0x10] sm:$0x1]  ;;  %v633_v19 = vld [vmem:[#allocation6 + $0x18] sm:$0x1] }
 0x28a   : > { %1460 = vrot.lane.b32.xlu1 %v3455_v12, %s2961_s10  ;;  %v2685_v23 = vpack.c.bf16 %v3564_v63, %v3570_v42  ;;  %v657_v24 = vsel %vm444_vm5, %v654_v15, %v656_v46  ;;  %v658_v26 = vsel %vm444_vm5, %v656_v46, %v654_v15  ;;  %v3595_v7 = vsel %vm1620_vm14, %v3246_v27, %v3341_v51  ;;  %v827_v63 = vld [vmem:[#allocation6 + $0x20] sm:$0xff] }
 0x28b   : > { %1462 = vrot.lane.b32.xlu0 %v3459_v13, %s2961_s10  ;;  %2620 = vmatprep.subr.bf16.mxu1 %v2619_v17  ;;  %v659_v2 = vmul.f32 %v658_v26, %v3184_v18  ;;  %v660_v3 = vmul.f32 %v657_v24, %v3186_v20  ;;  %v3605_v14 = vsel %vm1620_vm14, %v3341_v51, %v3246_v27 }
 0x28c   : > { %v670_v1 = vpop.permute.xlu1 %669  ;;  %2622 = vmatpush1.bf16.msra.mxu1 %v2621_v16  ;;  %v672_v25 = vpop.permute.xlu0 %671 }
 0x28d   : > { %v673_v40 = vsel %vm462_vm6, %v670_v1, %v672_v25  ;;  %v674_v6 = vsel %vm462_vm6, %v672_v25, %v670_v1  ;;  %v713_v1 = vrot.slane %v659_v2, 4  ;;  %v714_v25 = vrot.slane %v660_v3, 4 }
 0x28e   : > { %1476 = vrot.lane.b32.xlu1 %v3455_v12, %s2962_s8  ;;  %v675_v15 = vmul.f32 %v674_v6, %v3184_v18  ;;  %v676_v46 = vmul.f32 %v673_v40, %v3186_v20 }
 0x28f   : > { %1478 = vrot.lane.b32.xlu0 %v3459_v13, %s2962_s8 }
 0x290   : > { %v646_v8 = vpop.permute.xlu1 %645  ;;  %v648_v9 = vpop.permute.xlu0 %647  ;;  %v719_v24 = vrot.slane %v675_v15, 4  ;;  %v720_v26 = vrot.slane %v676_v46, 4 }
 0x291   : > { %v649_v10 = vsel %vm435_vm8, %v646_v8, %v648_v9  ;;  %v650_v11 = vsel %vm435_vm8, %v648_v9, %v646_v8 }
 0x292   : > { %1631 = vrot.lane.b32.xlu1 %v3595_v7, %s2957_s13  ;;  %v651_v43 = vmul.f32 %v650_v11, %v3184_v18  ;;  %v652_v47 = vmul.f32 %v649_v10, %v3186_v20 }
 0x293   : > { %1633 = vrot.lane.b32.xlu0 %v3605_v14, %s2957_s13 }
 0x294   : > { %v662_v17 = vpop.permute.xlu1 %661  ;;  %v664_v16 = vpop.permute.xlu0 %663  ;;  %v735_v8 = vsel %vm529_vm10, %v651_v43, %v713_v1  ;;  %v736_v10 = vsel %vm529_vm10, %v652_v47, %v714_v25 }
 0x295   : > { %v665_v27 = vsel %vm453_vm9, %v662_v17, %v664_v16  ;;  %v666_v51 = vsel %vm453_vm9, %v664_v16, %v662_v17 }
 0x296   : > { %v667_v40 = vmul.f32 %v666_v51, %v3184_v18  ;;  %v668_v6 = vmul.f32 %v665_v27, %v3186_v20  ;;  %1647 = vrot.lane.b32.xlu1 %v3595_v7, %s2958_s15 }
 0x297   : > { %1649 = vrot.lane.b32.xlu0 %v3605_v14, %s2958_s15 }
 0x298   : > { %v737_v9 = vsel %vm529_vm10, %v667_v40, %v719_v24  ;;  %v680_v2 = vpop.permute.xlu1 %679  ;;  %v682_v3 = vpop.permute.xlu0 %681  ;;  %v738_v11 = vsel %vm529_vm10, %v668_v6, %v720_v26 }
 0x299   : > { %v2623_v15 = vpack.c.bf16 %v738_v11, %v736_v10  ;;  %v2625_v46 = vpack.c.bf16 %v737_v9, %v735_v8  ;;  %v683_v47 = vsel %vm473_vm11, %v680_v2, %v682_v3  ;;  %v684_v25 = vsel %vm473_vm11, %v682_v3, %v680_v2 }
 0x29a   : > { %1468 = vrot.lane.b32.xlu1 %v3455_v12, %s2963_s18  ;;  %v685_v27 = vmul.f32 %v683_v47, %v3184_v18  ;;  %v686_v26 = vmul.f32 %v684_v25, %v3186_v20 }
 0x29b   : > { %1470 = vrot.lane.b32.xlu0 %v3459_v13, %s2963_s18  ;;  %2624 = vmatprep.subr.bf16.mxu0 %v2623_v15  ;;  %v677_v15 = vmul.f32 %v3304_v45, %v3184_v18 }
 0x29c   : > { %v696_v17 = vpop.permute.xlu1 %695  ;;  %2626 = vmatpush1.bf16.msra.mxu0 %v2625_v46  ;;  %v698_v43 = vpop.permute.xlu0 %697  ;;  %v725_v2 = vrot.slane %v685_v27, 4  ;;  %v726_v3 = vrot.slane %v686_v26, 4 }
 0x29d   : > { %v699_v51 = vsel %vm491_vm12, %v696_v17, %v698_v43  ;;  %v700_v24 = vsel %vm491_vm12, %v698_v43, %v696_v17  ;;  %v678_v43 = vmul.f32 %v3302_v44, %v3186_v20 }
 0x29e   : > { %1623 = vrot.lane.b32.xlu1 %v3595_v7, %s2959_s16  ;;  %v701_v8 = vmul.f32 %v699_v51, %v3184_v18  ;;  %v702_v9 = vmul.f32 %v700_v24, %v3186_v20  ;;  %v739_v45 = vsel %vm529_vm10, %v677_v15, %v725_v2 }
 0x29f   : > { %1625 = vrot.lane.b32.xlu0 %v3605_v14, %s2959_s16 }
 0x2a0   : > { %v851_v16 = vpop.permute.xlu1 %850  ;;  %v853_v1 = vpop.permute.xlu0 %852  ;;  %v731_v47 = vrot.slane %v701_v8, 4  ;;  %v732_v25 = vrot.slane %v702_v9, 4  ;;  %v740_v9 = vsel %vm529_vm10, %v678_v43, %v726_v3 }
 0x2a1   : > { %v855_v3 = vsel %vm444_vm5, %v853_v1, %v851_v16 }
 0x2a2   : > { %1639 = vrot.lane.b32.xlu1 %v3595_v7, %s2960_s12 }
 0x2a3   : > { %1641 = vrot.lane.b32.xlu0 %v3605_v14, %s2960_s12 }
 0x2a4   : > { %v867_v40 = vpop.permute.xlu1 %866  ;;  %v869_v6 = vpop.permute.xlu0 %868 }
 0x2a5   : > { %v870_v24 = vsel %vm462_vm6, %v867_v40, %v869_v6  ;;  %v871_v2 = vsel %vm462_vm6, %v869_v6, %v867_v40 }
 0x2a6   : > { %1657 = vrot.lane.b32.xlu1 %v3595_v7, %s2961_s10  ;;  %v872_v40 = vmul.f32 %v871_v2, %v3184_v18 }
 0x2a7   : > { %1659 = vrot.lane.b32.xlu0 %v3605_v14, %s2961_s10 }
 0x2a8   : > { %v688_v10 = vpop.permute.xlu1 %687  ;;  %v690_v11 = vpop.permute.xlu0 %689 }
 0x2a9   : > { %v691_v46 = vsel %vm482_vm13, %v688_v10, %v690_v11  ;;  %v692_v17 = vsel %vm482_vm13, %v690_v11, %v688_v10  ;;  %v854_v11 = vsel %vm444_vm5, %v851_v16, %v853_v1  ;;  %v3703_v1 = vsel %vm1817_vm15, %v3351_v52, %v3248_v28 }
 0x2aa   : > { %v693_v27 = vmul.f32 %v691_v46, %v3184_v18  ;;  %v694_v51 = vmul.f32 %v692_v17, %v3186_v20  ;;  %1673 = vrot.lane.b32.xlu1 %v3595_v7, %s2962_s8  ;;  %v873_v17 = vmul.f32 %v870_v24, %v3186_v20  ;;  %v857_v43 = vmul.f32 %v854_v11, %v3186_v20 }
 0x2ab   : > { %1675 = vrot.lane.b32.xlu0 %v3605_v14, %s2962_s8 }
 0x2ac   : > { %v741_v26 = vsel %vm529_vm10, %v693_v27, %v731_v47  ;;  %v843_v44 = vpop.permute.xlu1 %842  ;;  %v845_v8 = vpop.permute.xlu0 %844  ;;  %v742_v10 = vsel %vm529_vm10, %v694_v51, %v732_v25  ;;  %v3695_v27 = vsel %vm1817_vm15, %v3248_v28, %v3351_v52  ;;  %v911_v28 = vrot.slane %v857_v43, 4 }
 0x2ad   : > { %v2627_v15 = vpack.c.bf16 %v742_v10, %v740_v9  ;;  %v2629_v46 = vpack.c.bf16 %v741_v26, %v739_v45  ;;  %v846_v6 = vsel %vm435_vm8, %v843_v44, %v845_v8  ;;  %v847_v45 = vsel %vm435_vm8, %v845_v8, %v843_v44 }
 0x2ae   : > { %1665 = vrot.lane.b32.xlu1 %v3595_v7, %s2963_s18  ;;  %v856_v26 = vmul.f32 %v855_v3, %v3184_v18  ;;  %v917_v9 = vrot.slane %v873_v17, 4  ;;  %v849_v10 = vmul.f32 %v846_v6, %v3186_v20  ;;  %v916_v52 = vrot.slane %v872_v40, 4 }
 0x2af   : > { %1667 = vrot.lane.b32.xlu0 %v3605_v14, %s2963_s18  ;;  %2628 = vmatprep.subr.bf16.mxu0 %v2627_v15  ;;  %v848_v2 = vmul.f32 %v847_v45, %v3184_v18  ;;  %v3740_v45 = vld [vmem:[%s4482_s4] sm:$0xff] }
 0x2b0   : > { %v859_v47 = vpop.permute.xlu1 %858  ;;  %2630 = vmatpush1.bf16.msra.mxu0 %v2629_v46  ;;  %v861_v25 = vpop.permute.xlu0 %860  ;;  %v910_v40 = vrot.slane %v856_v26, 4 }
 0x2b1   : > { %v862_v51 = vsel %vm453_vm9, %v859_v47, %v861_v25  ;;  %v863_v16 = vsel %vm453_vm9, %v861_v25, %v859_v47  ;;  %v933_v47 = vsel %vm529_vm10, %v849_v10, %v911_v28 }
 0x2b2   : > { %v865_v24 = vmul.f32 %v862_v51, %v3186_v20  ;;  %1828 = vrot.lane.b32.xlu1 %v3695_v27, %s2957_s13  ;;  %v864_v11 = vmul.f32 %v863_v16, %v3184_v18 }
 0x2b3   : > { %1830 = vrot.lane.b32.xlu0 %v3703_v1, %s2957_s13 }
 0x2b4   : > { %v497_v44 = vpop.permute.xlu1 %496  ;;  %v499_v8 = vpop.permute.xlu0 %498  ;;  %v935_v17 = vsel %vm529_vm10, %v865_v24, %v917_v9  ;;  %v934_v6 = vsel %vm529_vm10, %v864_v11, %v916_v52  ;;  %v932_v24 = vsel %vm529_vm10, %v848_v2, %v910_v40 }
 0x2b5   : > { %v3719_v15 = vsel %vm500_vm0, %v497_v44, %v499_v8  ;;  %v3723_v46 = vsel %vm500_vm0, %v499_v8, %v497_v44  ;;  %v2631_v16 = vpack.c.bf16 %v935_v17, %v933_v47  ;;  %v2633_v10 = vpack.c.bf16 %v934_v6, %v932_v24  ;;  %v3760_v8 = vld [vmem:[%s4482_s4 + $0x8] sm:$0x1] }
 0x2b6   : > { %v503_v3 = vmul.f32 %v3719_v15, %v3184_v18  ;;  %v504_v43 = vmul.f32 %v3723_v46, %v3186_v20  ;;  %1844 = vrot.lane.b32.xlu1 %v3695_v27, %s2958_s15  ;;  %v2027_v37 = vmul.f32 %v3719_v15, %v3186_v20 }
 0x2b7   : > { %1846 = vrot.lane.b32.xlu0 %v3703_v1, %s2958_s15 }
 0x2b8   : > { %v877_v25 = vpop.permute.xlu1 %876  ;;  %2567 = vmatprep.subr.msk.mxu1 %vm529_vm10, %v504_v43  ;;  %v879_v51 = vpop.permute.xlu0 %878 }
 0x2b9   : > { %v880_v26 = vsel %vm473_vm11, %v877_v25, %v879_v51  ;;  %v881_v9 = vsel %vm473_vm11, %v879_v51, %v877_v25  ;;  %2568 = vmatpush1.msk.msra.mxu1 %vm529_vm10, %v503_v3  ;;  %v874_v51 = vmul.f32 %v3335_v50, %v3184_v18 }
 0x2ba   : > { %1820 = vrot.lane.b32.xlu1 %v3695_v27, %s2959_s16  ;;  %2632 = vmatprep.subr.bf16.mxu1 %v2631_v16  ;;  %v882_v11 = vmul.f32 %v880_v26, %v3184_v18  ;;  %v883_v28 = vmul.f32 %v881_v9, %v3186_v20  ;;  %v875_v26 = vmul.f32 %v3333_v49, %v3186_v20 }
 0x2bb   : > { %1822 = vrot.lane.b32.xlu0 %v3703_v1, %s2959_s16  ;;  %2569 = vmatmul.mubr.msk.f32.vlgmr.msra.gmra.mrb[0].mxu1 %vm540_vm1, %v3740_v45 }
 0x2bc   : > { %2634 = vmatpush1.bf16.msra.mxu1 %v2633_v10  ;;  %v893_v52 = vpop.permute.xlu1 %892  ;;  %v895_v44 = vpop.permute.xlu0 %894  ;;  %623 = vmatprep.mubr.f32.mxu1 %v2948_v0  ;;  %v922_v40 = vrot.slane %v882_v11, 4  ;;  %v923_v6 = vrot.slane %v883_v28, 4 }
 0x2bd   : > { %v896_v2 = vsel %vm491_vm12, %v893_v52, %v895_v44  ;;  %v897_v17 = vsel %vm491_vm12, %v895_v44, %v893_v52 }
 0x2be   : > { %v898_v3 = vmul.f32 %v896_v2, %v3184_v18  ;;  %v899_v43 = vmul.f32 %v897_v17, %v3186_v20  ;;  %1836 = vrot.lane.b32.xlu1 %v3695_v27, %s2960_s12  ;;  %v936_v50 = vsel %vm529_vm10, %v874_v51, %v922_v40  ;;  %v937_v49 = vsel %vm529_vm10, %v875_v26, %v923_v6 }
 0x2bf   : > { %1838 = vrot.lane.b32.xlu0 %v3703_v1, %s2960_s12  ;;  %2570 = vmatmul.mubr.msk.f32.gmra.mrb[2].mxu1 %vm540_vm1, %v3760_v8 }
 0x2c0   : > { %v885_v47 = vpop.permute.xlu1 %884  ;;  %v887_v25 = vpop.permute.xlu0 %886  ;;  %1010 = vmatprep.mubr.f32.mxu1 %v2948_v0  ;;  %v928_v9 = vrot.slane %v898_v3, 4  ;;  %v929_v10 = vrot.slane %v899_v43, 4 }
 0x2c1   : > { %v888_v16 = vsel %vm482_vm13, %v885_v47, %v887_v25  ;;  %v889_v24 = vsel %vm482_vm13, %v887_v25, %v885_v47 }
 0x2c2   : > { %v890_v11 = vmul.f32 %v888_v16, %v3184_v18  ;;  %v891_v28 = vmul.f32 %v889_v24, %v3186_v20  ;;  %1484 = vrot.lane.b32.xlu1 %v3455_v12, %s2964_s11 }
 0x2c3   : > { %1486 = vrot.lane.b32.xlu0 %v3459_v13, %s2964_s11 }
 0x2c4   : > { %v938_v52 = vsel %vm529_vm10, %v890_v11, %v928_v9  ;;  %v1048_v44 = vpop.permute.xlu1 %1047  ;;  %v1050_v2 = vpop.permute.xlu0 %1049  ;;  %v939_v17 = vsel %vm529_vm10, %v891_v28, %v929_v10 }
 0x2c5   : > { %v2635_v3 = vpack.c.bf16 %v939_v17, %v937_v49  ;;  %v2637_v43 = vpack.c.bf16 %v938_v52, %v936_v50  ;;  %v1051_v24 = vsel %vm444_vm5, %v1048_v44, %v1050_v2  ;;  %v1052_v26 = vsel %vm444_vm5, %v1050_v2, %v1048_v44 }
 0x2c6   : > { %1854 = vrot.lane.b32.xlu1 %v3695_v27, %s2961_s10  ;;  %v1054_v52 = vmul.f32 %v1051_v24, %v3186_v20  ;;  %v1053_v17 = vmul.f32 %v1052_v26, %v3184_v18 }
 0x2c7   : > { %1856 = vrot.lane.b32.xlu0 %v3703_v1, %s2961_s10  ;;  %2636 = vmatprep.subr.bf16.mxu1 %v2635_v3 }
 0x2c8   : > { %v1064_v47 = vpop.permute.xlu1 %1063  ;;  %2638 = vmatpush1.bf16.msra.mxu1 %v2637_v43  ;;  %v1066_v40 = vpop.permute.xlu0 %1065 }
 0x2c9   : > { %v1067_v6 = vsel %vm462_vm6, %v1064_v47, %v1066_v40  ;;  %v1068_v16 = vsel %vm462_vm6, %v1066_v40, %v1064_v47  ;;  %v1241_v47 = vsel %vm444_vm5, %v3250_v29, %v3357_v53 }
 0x2ca   : > { %1870 = vrot.lane.b32.xlu1 %v3695_v27, %s2962_s8  ;;  %v1070_v9 = vmul.f32 %v1067_v6, %v3186_v20  ;;  %v1069_v10 = vmul.f32 %v1068_v16, %v3184_v18 }
 0x2cb   : > { %1872 = vrot.lane.b32.xlu0 %v3703_v1, %s2962_s8 }
 0x2cc   : > { %v1040_v25 = vpop.permute.xlu1 %1039  ;;  %v1042_v51 = vpop.permute.xlu0 %1041  ;;  %v1114_v40 = vrot.slane %v1070_v9, 4  ;;  %v1113_v16 = vrot.slane %v1069_v10, 4 }
 0x2cd   : > { %v1043_v11 = vsel %vm435_vm8, %v1040_v25, %v1042_v51  ;;  %v1044_v49 = vsel %vm435_vm8, %v1042_v51, %v1040_v25  ;;  %v1242_v25 = vsel %vm444_vm5, %v3357_v53, %v3250_v29  ;;  %v1258_v51 = vsel %vm462_vm6, %v3367_v54, %v3252_v30 }
 0x2ce   : > { %1862 = vrot.lane.b32.xlu1 %v3695_v27, %s2963_s18  ;;  %v1046_v6 = vmul.f32 %v1043_v11, %v3186_v20  ;;  %v1045_v24 = vmul.f32 %v1044_v49, %v3184_v18  ;;  %v1107_v29 = vrot.slane %v1053_v17, 4  ;;  %v1257_v49 = vsel %vm462_vm6, %v3252_v30, %v3367_v54 }
 0x2cf   : > { %1864 = vrot.lane.b32.xlu0 %v3703_v1, %s2963_s18  ;;  %v3875_v30 = vmul.f32 %v1258_v51, %v3184_v18  ;;  %v1249_v54 = vsel %vm453_vm9, %v3256_v32, %v3384_v56 }
 0x2d0   : > { %v1056_v28 = vpop.permute.xlu1 %1055  ;;  %v1058_v50 = vpop.permute.xlu0 %1057 }
 0x2d1   : > { %v1059_v44 = vsel %vm453_vm9, %v1056_v28, %v1058_v50  ;;  %v1060_v2 = vsel %vm453_vm9, %v1058_v50, %v1056_v28  ;;  %v1108_v28 = vrot.slane %v1054_v52, 4  ;;  %v3856_v52 = vmul.f32 %v1242_v25, %v3184_v18 }
 0x2d2   : > { %v1061_v3 = vmul.f32 %v1060_v2, %v3184_v18  ;;  %v1062_v43 = vmul.f32 %v1059_v44, %v3186_v20  ;;  %1681 = vrot.lane.b32.xlu1 %v3595_v7, %s2964_s11 }
 0x2d3   : > { %1683 = vrot.lane.b32.xlu0 %v3605_v14, %s2964_s11  ;;  %v1130_v17 = vsel %vm529_vm10, %v1046_v6, %v1108_v28  ;;  %v1297_v51 = vrot.slane %v3856_v52, 4  ;;  %v1268_v28 = vsel %vm473_vm11, %v3396_v59, %v3258_v33  ;;  %v1292_v52 = vsel %vm500_vm0, %v3422_v62, %v3266_v38 }
 0x2d4   : > { %v704_v26 = vpop.permute.xlu1 %703  ;;  %v706_v9 = vpop.permute.xlu0 %705  ;;  %v1132_v44 = vsel %vm529_vm10, %v1062_v43, %v1114_v40  ;;  %v1131_v53 = vsel %vm529_vm10, %v1061_v3, %v1113_v16  ;;  %v1129_v3 = vsel %vm529_vm10, %v1045_v24, %v1107_v29  ;;  %v3869_v40 = vmul.f32 %v3390_v58, %v3184_v18 }
 0x2d5   : > { %v707_v11 = vsel %vm500_vm0, %v704_v26, %v706_v9  ;;  %v708_v50 = vsel %vm500_vm0, %v706_v9, %v704_v26  ;;  %v2639_v16 = vpack.c.bf16 %v1132_v44, %v1130_v17  ;;  %v3872_v26 = vmul.f32 %v1241_v47, %v3186_v20 }
 0x2d6   : > { %v709_v2 = vmul.f32 %v707_v11, %v3184_v18  ;;  %v710_v10 = vmul.f32 %v708_v50, %v3186_v20  ;;  %1878 = vrot.lane.b32.xlu1 %v3695_v27, %s2964_s11  ;;  %v2641_v6 = vpack.c.bf16 %v1131_v53, %v1129_v3  ;;  %v1260_v24 = vmul.f32 %v1257_v49, %v3186_v20 }
 0x2d7   : > { %1880 = vrot.lane.b32.xlu0 %v3703_v1, %s2964_s11  ;;  %v1233_v9 = vsel %vm435_vm8, %v3254_v31, %v3373_v55  ;;  %v1072_v11 = vmul.f32 %v3387_v57, %v3186_v20  ;;  %v1234_v50 = vsel %vm435_vm8, %v3373_v55, %v3254_v31  ;;  %v1250_v44 = vsel %vm453_vm9, %v3384_v56, %v3256_v32 }
 0x2d8   : > { %v1074_v43 = vpop.permute.xlu1 %1073  ;;  %2571 = vmatprep.subr.msk.mxu0 %vm529_vm10, %v710_v10  ;;  %v1076_v25 = vpop.permute.xlu0 %1075  ;;  %v1252_v29 = vmul.f32 %v1249_v54, %v3186_v20  ;;  %v1284_v53 = vsel %vm491_vm12, %v3406_v60, %v3260_v34  ;;  %v1298_v32 = vrot.slane %v3872_v26, 4  ;;  %v1303_v56 = vrot.slane %v3875_v30, 4 }
 0x2d9   : > { %2572 = vmatpush1.msk.msra.mxu0 %vm529_vm10, %v709_v2  ;;  %v1077_v58 = vsel %vm473_vm11, %v1074_v43, %v1076_v25  ;;  %v1078_v47 = vsel %vm473_vm11, %v1076_v25, %v1074_v43  ;;  %v1304_v17 = vrot.slane %v1260_v24, 4  ;;  %v1270_v3 = vmul.f32 %v1268_v28, %v3186_v20 }
 0x2da   : > { %2640 = vmatprep.subr.bf16.mxu0 %v2639_v16  ;;  %2573 = vmatmul.mubr.msk.f32.vlgmr.msra.gmra.mrb[2].mxu0 %vm540_vm1, %v3740_v45  ;;  %v1079_v10 = vmul.f32 %v1077_v58, %v3184_v18  ;;  %v1080_v49 = vmul.f32 %v1078_v47, %v3186_v20  ;;  %v1235_v43 = vmul.f32 %v1234_v50, %v3184_v18 }
 0x2db   : > { %2642 = vmatpush1.bf16.msra.mxu0 %v2641_v6  ;;  %819 = vmatprep.mubr.f32.mxu0 %v2948_v0  ;;  %v1267_v25 = vsel %vm473_vm11, %v3258_v33, %v3396_v59  ;;  %v1236_v26 = vmul.f32 %v1233_v9, %v3186_v20  ;;  %v1251_v30 = vmul.f32 %v1250_v44, %v3184_v18  ;;  %v1310_v44 = vrot.slane %v1270_v3, 4 }
 0x2dc   : > { %v1090_v57 = vpop.permute.xlu1 %1089  ;;  %v1092_v2 = vpop.permute.xlu0 %1091  ;;  %v1286_v6 = vmul.f32 %v1284_v53, %v3186_v20  ;;  %v1322_v58 = vsel %vm529_vm10, %v1252_v29, %v1304_v17  ;;  %v1283_v33 = vsel %vm491_vm12, %v3260_v34, %v3406_v60  ;;  %v1276_v59 = vsel %vm482_vm13, %v3412_v61, %v3262_v36 }
 0x2dd   : > { %v1093_v31 = vsel %vm491_vm12, %v1090_v57, %v1092_v2  ;;  %v1094_v55 = vsel %vm491_vm12, %v1092_v2, %v1090_v57  ;;  %v1119_v47 = vrot.slane %v1079_v10, 4  ;;  %v1120_v28 = vrot.slane %v1080_v49, 4 }
 0x2de   : > { %2574 = vmatmul.mubr.msk.f32.gmra.mrb[4].mxu0 %vm540_vm1, %v3760_v8  ;;  %v1095_v16 = vmul.f32 %v1093_v31, %v3184_v18  ;;  %v1096_v54 = vmul.f32 %v1094_v55, %v3186_v20  ;;  %v1269_v50 = vmul.f32 %v1267_v25, %v3184_v18  ;;  %v1285_v31 = vmul.f32 %v1283_v33, %v3184_v18 }
 0x2df   : > { %1207 = vmatprep.mubr.f32.mxu0 %v2948_v0  ;;  %v1316_v10 = vrot.slane %v1286_v6, 4  ;;  %v1275_v49 = vsel %vm482_vm13, %v3262_v36, %v3412_v61  ;;  %v1278_v55 = vmul.f32 %v1276_v59, %v3186_v20  ;;  %v1133_v3 = vsel %vm529_vm10, %v3869_v40, %v1119_v47 }
 0x2e0   : > { %v1082_v24 = vpop.permute.xlu1 %1081  ;;  %v1084_v9 = vpop.permute.xlu0 %1083  ;;  %v1125_v57 = vrot.slane %v1095_v16, 4  ;;  %v1126_v2 = vrot.slane %v1096_v54, 4  ;;  %v1134_v54 = vsel %vm529_vm10, %v1072_v11, %v1120_v28  ;;  %v1277_v59 = vmul.f32 %v1275_v49, %v3184_v18 }
 0x2e1   : > { %v1085_v53 = vsel %vm482_vm13, %v1082_v24, %v1084_v9  ;;  %v1086_v29 = vsel %vm482_vm13, %v1084_v9, %v1082_v24  ;;  %v1321_v47 = vsel %vm529_vm10, %v1251_v30, %v1303_v56  ;;  %v1320_v28 = vsel %vm529_vm10, %v1236_v26, %v1298_v32 }
 0x2e2   : > { %v1087_v34 = vmul.f32 %v1085_v53, %v3184_v18  ;;  %v1088_v60 = vmul.f32 %v1086_v29, %v3186_v20  ;;  %v1262_v53 = vmul.f32 %v3195_v22, %v3186_v20  ;;  %v1326_v29 = vsel %vm529_vm10, %v1278_v55, %v1316_v10 }
 0x2e3   : > { %v1319_v56 = vsel %vm529_vm10, %v1235_v43, %v1297_v51  ;;  %v1261_v26 = vmul.f32 %v3189_v21, %v3184_v18  ;;  %v1291_v21 = vsel %vm500_vm0, %v3266_v38, %v3422_v62 }
 0x2e4   : > { %v901_v17 = vpop.permute.xlu1 %900  ;;  %v1135_v25 = vsel %vm529_vm10, %v1087_v34, %v1125_v57  ;;  %v903_v16 = vpop.permute.xlu0 %902  ;;  %v1136_v24 = vsel %vm529_vm10, %v1088_v60, %v1126_v2  ;;  %v1309_v57 = vrot.slane %v1269_v50, 4  ;;  %v1315_v2 = vrot.slane %v1285_v31, 4 }
 0x2e5   : > { %v904_v6 = vsel %vm500_vm0, %v901_v17, %v903_v16  ;;  %v905_v33 = vsel %vm500_vm0, %v903_v16, %v901_v17  ;;  %v2643_v36 = vpack.c.bf16 %v1136_v24, %v1134_v54  ;;  %v2645_v61 = vpack.c.bf16 %v1135_v25, %v1133_v3 }
 0x2e6   : > { %v906_v9 = vmul.f32 %v904_v6, %v3184_v18  ;;  %v907_v40 = vmul.f32 %v905_v33, %v3186_v20  ;;  %v2647_v60 = vpack.c.bf16 %v1322_v58, %v1320_v28  ;;  %v2649_v30 = vpack.c.bf16 %v1321_v47, %v1319_v56 }
 0x2e7   : > { %2644 = vmatprep.subr.bf16.mxu0 %v2643_v36  ;;  %v1324_v32 = vsel %vm529_vm10, %v1262_v53, %v1310_v44  ;;  %v1325_v50 = vsel %vm529_vm10, %v1277_v59, %v1315_v2  ;;  %v1323_v58 = vsel %vm529_vm10, %v1261_v26, %v1309_v57  ;;  %v1294_v31 = vmul.f32 %v1292_v52, %v3186_v20 }
 0x2e8   : > { %v1435_v11 = vpop.permute.xlu1 %1434  ;;  %2575 = vmatprep.subr.msk.mxu1 %vm529_vm10, %v907_v40  ;;  %2646 = vmatpush1.bf16.msra.mxu0 %v2645_v61  ;;  %v2651_v22 = vpack.c.bf16 %v1326_v29, %v1324_v32  ;;  %v2653_v44 = vpack.c.bf16 %v1325_v50, %v1323_v58  ;;  %v1293_v17 = vmul.f32 %v1291_v21, %v3184_v18 }
 0x2e9   : > { %v1437_v34 = vpop.permute.xlu0 %1436  ;;  %2576 = vmatpush1.msk.msra.mxu1 %vm529_vm10, %v906_v9 }
 0x2ea   : > { %2648 = vmatprep.subr.bf16.mxu1 %v2647_v60  ;;  %2577 = vmatmul.mubr.msk.f32.vlgmr.msra.gmra.mrb[4].mxu1 %vm540_vm1, %v3740_v45  ;;  %v1438_v62 = vsel %vm444_vm5, %v1435_v11, %v1437_v34  ;;  %v1439_v3 = vsel %vm444_vm5, %v1437_v34, %v1435_v11 }
 0x2eb   : > { %2650 = vmatpush1.bf16.msra.mxu1 %v2649_v30  ;;  %1016 = vmatprep.mubr.f32.mxu1 %v2948_v0  ;;  %v1441_v33 = vmul.f32 %v1438_v62, %v3186_v20  ;;  %v1440_v9 = vmul.f32 %v1439_v3, %v3184_v18 }
 0x2ec   : > { %v1451_v51 = vpop.permute.xlu1 %1450  ;;  %2652 = vmatprep.subr.bf16.mxu1 %v2651_v22 }
 0x2ed   : > { %v1453_v43 = vpop.permute.xlu0 %1452  ;;  %v1495_v34 = vrot.slane %v1441_v33, 4  ;;  %v1494_v32 = vrot.slane %v1440_v9, 4  ;;  %v1458_v9 = vmul.f32 %v3455_v12, %v3184_v18 }
 0x2ee   : > { %2578 = vmatmul.mubr.msk.f32.gmra.mrb[6].mxu1 %vm540_vm1, %v3760_v8  ;;  %v1454_v49 = vsel %vm462_vm6, %v1451_v51, %v1453_v43  ;;  %v1455_v38 = vsel %vm462_vm6, %v1453_v43, %v1451_v51 }
 0x2ef   : > { %2654 = vmatpush1.bf16.msra.mxu1 %v2653_v44  ;;  %1397 = vmatprep.mubr.f32.mxu1 %v2948_v0  ;;  %v1457_v25 = vmul.f32 %v1454_v49, %v3186_v20  ;;  %v1456_v54 = vmul.f32 %v1455_v38, %v3184_v18 }
 0x2f0   : > { %v1427_v10 = vpop.permute.xlu1 %1426  ;;  %2583 = vmatprep.subr.msk.mxu1 %vm529_vm10, %v1294_v31 }
 0x2f1   : > { %v1429_v55 = vpop.permute.xlu0 %1428  ;;  %v1501_v11 = vrot.slane %v1457_v25, 4  ;;  %v1500_v29 = vrot.slane %v1456_v54, 4 }
 0x2f2   : > { %v1430_v24 = vsel %vm435_vm8, %v1427_v10, %v1429_v55  ;;  %v1431_v36 = vsel %vm435_vm8, %v1429_v55, %v1427_v10 }
 0x2f3   : > { %2584 = vmatpush1.msk.msra.mxu1 %vm529_vm10, %v1293_v17  ;;  %v1433_v28 = vmul.f32 %v1430_v24, %v3186_v20  ;;  %v1432_v57 = vmul.f32 %v1431_v36, %v3184_v18 }
 0x2f4   : > { %v1443_v16 = vpop.permute.xlu1 %1442  ;;  %2585 = vmatmul.mubr.msk.f32.vlgmr.msra.gmra.mrb[8].mxu1 %vm540_vm1, %v3740_v45 }
 0x2f5   : > { %v1445_v6 = vpop.permute.xlu0 %1444  ;;  %1403 = vmatprep.mubr.f32.mxu1 %v2948_v0  ;;  %v1517_v51 = vsel %vm529_vm10, %v1433_v28, %v1495_v34  ;;  %v1516_v43 = vsel %vm529_vm10, %v1432_v57, %v1494_v32 }
 0x2f6   : > { %v1446_v61 = vsel %vm453_vm9, %v1443_v16, %v1445_v6  ;;  %v1447_v59 = vsel %vm453_vm9, %v1445_v6, %v1443_v16 }
 0x2f7   : > { %v1448_v40 = vmul.f32 %v1447_v59, %v3184_v18  ;;  %v1449_v47 = vmul.f32 %v1446_v61, %v3186_v20 }
 0x2f8   : > { %v1098_v53 = vpop.permute.xlu1 %1097  ;;  %2586 = vmatmul.mubr.msk.f32.gmra.mrb[10].mxu1 %vm540_vm1, %v3760_v8 }
 0x2f9   : > { %v1100_v2 = vpop.permute.xlu0 %1099  ;;  %v1519_v30 = vsel %vm529_vm10, %v1449_v47, %v1501_v11  ;;  %1791 = vmatprep.mubr.f32.mxu1 %v2948_v0  ;;  %v1518_v22 = vsel %vm529_vm10, %v1448_v40, %v1500_v29  ;;  %v1459_v47 = vmul.f32 %v3459_v13, %v3186_v20 }
 0x2fa   : > { %v1101_v60 = vsel %vm500_vm0, %v1098_v53, %v1100_v2  ;;  %v1102_v56 = vsel %vm500_vm0, %v1100_v2, %v1098_v53  ;;  %v2655_v44 = vpack.c.bf16 %v1519_v30, %v1517_v51  ;;  %v2657_v21 = vpack.c.bf16 %v1518_v22, %v1516_v43 }
 0x2fb   : > { %v1103_v26 = vmul.f32 %v1101_v60, %v3184_v18  ;;  %v1104_v50 = vmul.f32 %v1102_v56, %v3186_v20 }
 0x2fc   : > { %v1461_v52 = vpop.permute.xlu1 %1460 }
 0x2fd   : > { %2579 = vmatprep.subr.msk.mxu0 %vm529_vm10, %v1104_v50  ;;  %v1463_v58 = vpop.permute.xlu0 %1462 }
 0x2fe   : > { %2580 = vmatpush1.msk.msra.mxu0 %vm529_vm10, %v1103_v26  ;;  %v1464_v55 = vsel %vm473_vm11, %v1461_v52, %v1463_v58  ;;  %v1465_v17 = vsel %vm473_vm11, %v1463_v58, %v1461_v52 }
 0x2ff   : > { %2656 = vmatprep.subr.bf16.mxu0 %v2655_v44  ;;  %2581 = vmatmul.mubr.msk.f32.vlgmr.msra.gmra.mrb[6].mxu0 %vm540_vm1, %v3740_v45  ;;  %v1466_v62 = vmul.f32 %v1464_v55, %v3184_v18  ;;  %v1467_v3 = vmul.f32 %v1465_v17, %v3186_v20 }
 0x300   : > { %2658 = vmatpush1.bf16.msra.mxu0 %v2657_v21  ;;  %v1477_v31 = vpop.permute.xlu1 %1476  ;;  %1213 = vmatprep.mubr.f32.mxu0 %v2948_v0 }
 0x301   : > { %v1479_v10 = vpop.permute.xlu0 %1478  ;;  %v1506_v36 = vrot.slane %v1466_v62, 4  ;;  %v1507_v61 = vrot.slane %v1467_v3, 4 }
 0x302   : > { %v1480_v25 = vsel %vm491_vm12, %v1477_v31, %v1479_v10  ;;  %v1481_v16 = vsel %vm491_vm12, %v1479_v10, %v1477_v31 }
 0x303   : > { %2582 = vmatmul.mubr.msk.f32.gmra.mrb[8].mxu0 %vm540_vm1, %v3760_v8  ;;  %v1482_v6 = vmul.f32 %v1480_v25, %v3184_v18  ;;  %v1483_v33 = vmul.f32 %v1481_v16, %v3186_v20  ;;  %v1520_v13 = vsel %vm529_vm10, %v1458_v9, %v1506_v36  ;;  %v1521_v32 = vsel %vm529_vm10, %v1459_v47, %v1507_v61 }
 0x304   : > { %v1632_v49 = vpop.permute.xlu1 %1631  ;;  %1594 = vmatprep.mubr.f32.mxu0 %v2948_v0 }
 0x305   : > { %v1634_v38 = vpop.permute.xlu0 %1633  ;;  %v1512_v57 = vrot.slane %v1482_v6, 4  ;;  %v1513_v2 = vrot.slane %v1483_v33, 4 }
 0x306   : > { %v1635_v11 = vsel %vm444_vm5, %v1632_v49, %v1634_v38  ;;  %v1636_v28 = vsel %vm444_vm5, %v1634_v38, %v1632_v49 }
 0x307   : > { %v1637_v22 = vmul.f32 %v1636_v28, %v3184_v18  ;;  %v1638_v26 = vmul.f32 %v1635_v11, %v3186_v20 }
 0x308   : > { %v1648_v54 = vpop.permute.xlu1 %1647 }
 0x309   : > { %v1650_v24 = vpop.permute.xlu0 %1649  ;;  %v1691_v62 = vrot.slane %v1637_v22, 4  ;;  %v1692_v3 = vrot.slane %v1638_v26, 4 }
 0x30a   : > { %v1651_v60 = vsel %vm462_vm6, %v1648_v54, %v1650_v24  ;;  %v1652_v56 = vsel %vm462_vm6, %v1650_v24, %v1648_v54 }
 0x30b   : > { %v1653_v31 = vmul.f32 %v1652_v56, %v3184_v18  ;;  %v1654_v10 = vmul.f32 %v1651_v60, %v3186_v20 }
 0x30c   : > { %v1469_v59 = vpop.permute.xlu1 %1468 }
 0x30d   : > { %v1471_v40 = vpop.permute.xlu0 %1470  ;;  %v1697_v54 = vrot.slane %v1653_v31, 4  ;;  %v1698_v24 = vrot.slane %v1654_v10, 4 }
 0x30e   : > { %v1472_v53 = vsel %vm482_vm13, %v1469_v59, %v1471_v40  ;;  %v1473_v29 = vsel %vm482_vm13, %v1471_v40, %v1469_v59 }
 0x30f   : > { %v1474_v12 = vmul.f32 %v1472_v53, %v3184_v18  ;;  %v1475_v34 = vmul.f32 %v1473_v29, %v3186_v20 }
 0x310   : > { %v1624_v30 = vpop.permute.xlu1 %1623 }
 0x311   : > { %v1522_v50 = vsel %vm529_vm10, %v1474_v12, %v1512_v57  ;;  %v1626_v52 = vpop.permute.xlu0 %1625  ;;  %v1523_v51 = vsel %vm529_vm10, %v1475_v34, %v1513_v2 }
 0x312   : > { %v1627_v43 = vsel %vm435_vm8, %v1624_v30, %v1626_v52  ;;  %v1628_v58 = vsel %vm435_vm8, %v1626_v52, %v1624_v30  ;;  %v2659_v44 = vpack.c.bf16 %v1523_v51, %v1521_v32  ;;  %v2661_v21 = vpack.c.bf16 %v1522_v50, %v1520_v13 }
 0x313   : > { %v1629_v55 = vmul.f32 %v1628_v58, %v3184_v18  ;;  %v1630_v17 = vmul.f32 %v1627_v43, %v3186_v20  ;;  %v1655_v52 = vmul.f32 %v3595_v7, %v3184_v18  ;;  %v1656_v58 = vmul.f32 %v3605_v14, %v3186_v20 }
 0x314   : > { %2660 = vmatprep.subr.bf16.mxu0 %v2659_v44  ;;  %v1640_v49 = vpop.permute.xlu1 %1639 }
 0x315   : > { %2662 = vmatpush1.bf16.msra.mxu0 %v2661_v21  ;;  %v1642_v38 = vpop.permute.xlu0 %1641  ;;  %v1713_v61 = vsel %vm529_vm10, %v1629_v55, %v1691_v62  ;;  %v1714_v40 = vsel %vm529_vm10, %v1630_v17, %v1692_v3 }
 0x316   : > { %v1643_v25 = vsel %vm453_vm9, %v1640_v49, %v1642_v38  ;;  %v1644_v16 = vsel %vm453_vm9, %v1642_v38, %v1640_v49 }
 0x317   : > { %v1645_v6 = vmul.f32 %v1644_v16, %v3184_v18  ;;  %v1646_v33 = vmul.f32 %v1643_v25, %v3186_v20 }
 0x318   : > { %v1658_v36 = vpop.permute.xlu1 %1657 }
 0x319   : > { %v1715_v59 = vsel %vm529_vm10, %v1645_v6, %v1697_v54  ;;  %v1660_v9 = vpop.permute.xlu0 %1659  ;;  %v1716_v47 = vsel %vm529_vm10, %v1646_v33, %v1698_v24 }
 0x31a   : > { %v1661_v11 = vsel %vm473_vm11, %v1658_v36, %v1660_v9  ;;  %v1662_v28 = vsel %vm473_vm11, %v1660_v9, %v1658_v36  ;;  %v2663_v53 = vpack.c.bf16 %v1716_v47, %v1714_v40  ;;  %v2665_v29 = vpack.c.bf16 %v1715_v59, %v1713_v61 }
 0x31b   : > { %v1663_v2 = vmul.f32 %v1661_v11, %v3184_v18  ;;  %v1664_v12 = vmul.f32 %v1662_v28, %v3186_v20 }
 0x31c   : > { %2664 = vmatprep.subr.bf16.mxu1 %v2663_v53  ;;  %v1674_v57 = vpop.permute.xlu1 %1673 }
 0x31d   : > { %v1676_v34 = vpop.permute.xlu0 %1675  ;;  %2666 = vmatpush1.bf16.msra.mxu1 %v2665_v29  ;;  %v1703_v22 = vrot.slane %v1663_v2, 4  ;;  %v1704_v26 = vrot.slane %v1664_v12, 4 }
 0x31e   : > { %v1677_v13 = vsel %vm491_vm12, %v1674_v57, %v1676_v34  ;;  %v1678_v60 = vsel %vm491_vm12, %v1676_v34, %v1674_v57 }
 0x31f   : > { %v1679_v56 = vmul.f32 %v1677_v13, %v3184_v18  ;;  %v1680_v30 = vmul.f32 %v1678_v60, %v3186_v20  ;;  %v1717_v55 = vsel %vm529_vm10, %v1655_v52, %v1703_v22  ;;  %v1718_v38 = vsel %vm529_vm10, %v1656_v58, %v1704_v26 }
 0x320   : > { %v1666_v32 = vpop.permute.xlu1 %1665 }
 0x321   : > { %v1668_v50 = vpop.permute.xlu0 %1667  ;;  %v1709_v44 = vrot.slane %v1679_v56, 4  ;;  %v1710_v21 = vrot.slane %v1680_v30, 4 }
 0x322   : > { %v1669_v51 = vsel %vm482_vm13, %v1666_v32, %v1668_v50  ;;  %v1670_v43 = vsel %vm482_vm13, %v1668_v50, %v1666_v32 }
 0x323   : > { %v1671_v31 = vmul.f32 %v1669_v51, %v3184_v18  ;;  %v1672_v10 = vmul.f32 %v1670_v43, %v3186_v20 }
 0x324   : > { %v1829_v49 = vpop.permute.xlu1 %1828 }
 0x325   : > { %v1719_v7 = vsel %vm529_vm10, %v1671_v31, %v1709_v44  ;;  %v1831_v17 = vpop.permute.xlu0 %1830  ;;  %v1720_v62 = vsel %vm529_vm10, %v1672_v10, %v1710_v21 }
 0x326   : > { %v2667_v3 = vpack.c.bf16 %v1720_v62, %v1718_v38  ;;  %v2669_v25 = vpack.c.bf16 %v1719_v7, %v1717_v55  ;;  %v1832_v36 = vsel %vm444_vm5, %v1829_v49, %v1831_v17  ;;  %v1833_v61 = vsel %vm444_vm5, %v1831_v17, %v1829_v49 }
 0x327   : > { %v1835_v28 = vmul.f32 %v1832_v36, %v3186_v20  ;;  %v1834_v2 = vmul.f32 %v1833_v61, %v3184_v18  ;;  %vm2215_vm5 = vcmask 1044480  }
 0x328   : > { %2668 = vmatprep.subr.bf16.mxu1 %v2667_v3  ;;  %v1845_v14 = vpop.permute.xlu1 %1844 }
 0x329   : > { %v1847_v16 = vpop.permute.xlu0 %1846  ;;  %2670 = vmatpush1.bf16.msra.mxu1 %v2669_v25  ;;  %v1889_v26 = vrot.slane %v1835_v28, 4  ;;  %v1888_v43 = vrot.slane %v1834_v2, 4  ;;  %v1853_v28 = vmul.f32 %v3703_v1, %v3186_v20 }
 0x32a   : > { %v1848_v24 = vsel %vm462_vm6, %v1845_v14, %v1847_v16  ;;  %v1849_v33 = vsel %vm462_vm6, %v1847_v16, %v1845_v14  ;;  %vm2230_vm6 = vcmask 1045504  }
 0x32b   : > { %v1851_v59 = vmul.f32 %v1848_v24, %v3186_v20  ;;  %v1850_v40 = vmul.f32 %v1849_v33, %v3184_v18 }
 0x32c   : > { %v1821_v54 = vpop.permute.xlu1 %1820 }
 0x32d   : > { %v1823_v6 = vpop.permute.xlu0 %1822  ;;  %v1895_v13 = vrot.slane %v1851_v59, 4  ;;  %v1894_v30 = vrot.slane %v1850_v40, 4  ;;  %v1852_v40 = vmul.f32 %v3695_v27, %v3184_v18 }
 0x32e   : > { %v1824_v47 = vsel %vm435_vm8, %v1821_v54, %v1823_v6  ;;  %v1825_v53 = vsel %vm435_vm8, %v1823_v6, %v1821_v54 }
 0x32f   : > { %v1827_v60 = vmul.f32 %v1824_v47, %v3186_v20  ;;  %v1826_v32 = vmul.f32 %v1825_v53, %v3184_v18 }
 0x330   : > { %v1837_v9 = vpop.permute.xlu1 %1836 }
 0x331   : > { %v1839_v11 = vpop.permute.xlu0 %1838  ;;  %v1911_v10 = vsel %vm529_vm10, %v1827_v60, %v1889_v26  ;;  %v1910_v49 = vsel %vm529_vm10, %v1826_v32, %v1888_v43 }
 0x332   : > { %v1840_v29 = vsel %vm453_vm9, %v1837_v9, %v1839_v11  ;;  %v1841_v57 = vsel %vm453_vm9, %v1839_v11, %v1837_v9 }
 0x333   : > { %v1842_v12 = vmul.f32 %v1841_v57, %v3184_v18  ;;  %v1843_v34 = vmul.f32 %v1840_v29, %v3186_v20 }
 0x334   : > { %v1485_v56 = vpop.permute.xlu1 %1484 }
 0x335   : > { %v1487_v22 = vpop.permute.xlu0 %1486  ;;  %v1913_v51 = vsel %vm529_vm10, %v1843_v34, %v1895_v13  ;;  %v1912_v58 = vsel %vm529_vm10, %v1842_v12, %v1894_v30 }
 0x336   : > { %v1488_v50 = vsel %vm500_vm0, %v1485_v56, %v1487_v22  ;;  %v1489_v52 = vsel %vm500_vm0, %v1487_v22, %v1485_v56  ;;  %v2671_v7 = vpack.c.bf16 %v1913_v51, %v1911_v10  ;;  %v2673_v62 = vpack.c.bf16 %v1912_v58, %v1910_v49 }
 0x337   : > { %v1490_v44 = vmul.f32 %v1488_v50, %v3184_v18  ;;  %v1491_v21 = vmul.f32 %v1489_v52, %v3186_v20  ;;  %v4500_v10 = vpack.c.bf16 %v3504_v39, %v3481_v5 }
 0x338   : > { %v1855_v31 = vpop.permute.xlu1 %1854 }
 0x339   : > { %2587 = vmatprep.subr.msk.mxu0 %vm529_vm10, %v1491_v21  ;;  %v1857_v55 = vpop.permute.xlu0 %1856 }
 0x33a   : > { %v1858_v17 = vsel %vm473_vm11, %v1855_v31, %v1857_v55  ;;  %v1859_v38 = vsel %vm473_vm11, %v1857_v55, %v1855_v31  ;;  %2588 = vmatpush1.msk.msra.mxu0 %vm529_vm10, %v1490_v44  ;;  %v4499_v31 = vpack.c.bf16 %v3501_v35, %v3478_v4  ;;  %v2026_v4 = vmul.f32 %v3723_v46, %v3184_v18 }
 0x33b   : > { %2589 = vmatmul.mubr.msk.f32.vlgmr.msra.gmra.mrb[10].mxu0 %vm540_vm1, %v3740_v45  ;;  %2672 = vmatprep.subr.bf16.mxu0 %v2671_v7  ;;  %v1860_v25 = vmul.f32 %v1858_v17, %v3184_v18  ;;  %v1861_v14 = vmul.f32 %v1859_v38, %v3186_v20 }
 0x33c   : > { %2674 = vmatpush1.bf16.msra.mxu0 %v2673_v62  ;;  %v1871_v3 = vpop.permute.xlu1 %1870  ;;  %1600 = vmatprep.mubr.f32.mxu0 %v2948_v0 }
 0x33d   : > { %v1873_v16 = vpop.permute.xlu0 %1872  ;;  %v1900_v61 = vrot.slane %v1860_v25, 4  ;;  %v1901_v59 = vrot.slane %v1861_v14, 4 }
 0x33e   : > { %v1874_v54 = vsel %vm491_vm12, %v1871_v3, %v1873_v16  ;;  %v1875_v24 = vsel %vm491_vm12, %v1873_v16, %v1871_v3 }
 0x33f   : > { %v1876_v6 = vmul.f32 %v1874_v54, %v3184_v18  ;;  %v1877_v33 = vmul.f32 %v1875_v24, %v3186_v20  ;;  %2590 = vmatmul.mubr.msk.f32.gmra.mrb[12].mxu0 %vm540_vm1, %v3760_v8  ;;  %v1914_v34 = vsel %vm529_vm10, %v1852_v40, %v1900_v61  ;;  %v1915_v60 = vsel %vm529_vm10, %v1853_v28, %v1901_v59  ;;  %v631_v61 = vld [vmem:[#allocation6 + $0x8] sm:$0xff]  ;;  %v1026_v28 = vld [vmem:[#allocation6 + $0x50] sm:$0x1] }
 0x340   : > { %v1863_v36 = vpop.permute.xlu1 %1862  ;;  %1988 = vmatprep.mubr.f32.mxu0 %v2948_v0 }
 0x341   : > { %v1865_v9 = vpop.permute.xlu0 %1864  ;;  %v1906_v53 = vrot.slane %v1876_v6, 4  ;;  %v1907_v29 = vrot.slane %v1877_v33, 4  ;;  %v1024_v6 = vld [vmem:[#allocation6 + $0x40] sm:$0xff] }
 0x342   : > { %v1866_v47 = vsel %vm482_vm13, %v1863_v36, %v1865_v9  ;;  %v1867_v11 = vsel %vm482_vm13, %v1865_v9, %v1863_v36  ;;  %v630_v33 = vld [vmem:[#allocation6] sm:$0xff]  ;;  %v1025_v36 = vld [vmem:[#allocation6 + $0x48] sm:$0xff] }
 0x343   : > { %v1868_v57 = vmul.f32 %v1866_v47, %v3184_v18  ;;  %v1869_v2 = vmul.f32 %v1867_v11, %v3186_v20 }
 0x344   : > { %v1682_v12 = vpop.permute.xlu1 %1681 }
 0x345   : > { %v1916_v27 = vsel %vm529_vm10, %v1868_v57, %v1906_v53  ;;  %v1684_v13 = vpop.permute.xlu0 %1683  ;;  %v1917_v56 = vsel %vm529_vm10, %v1869_v2, %v1907_v29  ;;  %v1027_v57 = vld [vmem:[#allocation6 + $0x58] sm:$0x1] }
 0x346   : > { %v1685_v30 = vsel %vm500_vm0, %v1682_v12, %v1684_v13  ;;  %v1686_v1 = vsel %vm500_vm0, %v1684_v13, %v1682_v12  ;;  %v2675_v32 = vpack.c.bf16 %v1917_v56, %v1915_v60  ;;  %v2677_v22 = vpack.c.bf16 %v1916_v27, %v1914_v34 }
 0x347   : > { %v1687_v26 = vmul.f32 %v1685_v30, %v3184_v18  ;;  %v1688_v50 = vmul.f32 %v1686_v1, %v3186_v20 }
 0x348   : > { %2676 = vmatprep.subr.bf16.mxu0 %v2675_v32  ;;  %v1879_v52 = vpop.permute.xlu1 %1878 }
 0x349   : > { %2678 = vmatpush1.bf16.msra.mxu0 %v2677_v22  ;;  %v1881_v51 = vpop.permute.xlu0 %1880  ;;  %2591 = vmatprep.subr.msk.mxu1 %vm529_vm10, %v1688_v50 }
 0x34a   : > { %v1882_v43 = vsel %vm500_vm0, %v1879_v52, %v1881_v51  ;;  %v1883_v58 = vsel %vm500_vm0, %v1881_v51, %v1879_v52  ;;  %2592 = vmatpush1.msk.msra.mxu1 %vm529_vm10, %v1687_v26  ;;  %v1411_v51 = vld [vmem:[#allocation6 + $0x80] sm:$0xff] }
 0x34b   : > { %v1884_v44 = vmul.f32 %v1882_v43, %v3184_v18  ;;  %v1885_v21 = vmul.f32 %v1883_v58, %v3186_v20  ;;  %2593 = vmatmul.mubr.msk.f32.vlgmr.msra.gmra.mrb[12].mxu1 %vm540_vm1, %v3740_v45  ;;  %2680 = vmatprep.subr.bf16.mxu1 %v4499_v31  ;;  %v828_v18 = vld [vmem:[#allocation6 + $0x28] sm:$0xff]  ;;  %v1414_v31 = vld [vmem:[#allocation6 + $0x98] sm:$0x1] }
 0x34c   : > { %2682 = vmatpush1.bf16.msra.mxu1 %v4500_v10  ;;  %1797 = vmatprep.mubr.f32.mxu1 %v2948_v0  ;;  %v1412_v58 = vld [vmem:[#allocation6 + $0x88] sm:$0xff] }
 0x34d   : > { %2595 = vmatprep.subr.msk.mxu0 %vm529_vm10, %v1885_v21  ;;  %2684 = vmatprep.subr.bf16.mxu1 %v2683_v41 }
 0x34e   : > { %2596 = vmatpush1.msk.msra.mxu0 %vm529_vm10, %v1884_v44  ;;  %v1413_v44 = vld [vmem:[#allocation6 + $0x90] sm:$0x1] }
 0x34f   : > { %2594 = vmatmul.mubr.msk.f32.gmra.mrb[14].mxu1 %vm540_vm1, %v3760_v8  ;;  %2597 = vmatmul.mubr.msk.f32.vlgmr.msra.gmra.mrb[14].mxu0 %vm540_vm1, %v3740_v45 }
 0x350   : > { %2686 = vmatpush1.bf16.msra.mxu1 %v2685_v23  ;;  %1994 = vmatprep.mubr.f32.mxu0 %v2948_v0 }
 0x351   : > { %2599 = vmatprep.subr.msk.mxu1 %vm529_vm10, %v2027_v37  ;;  %2130 = vmatprep.mubr.f32.mxu1 %v2948_v0 }
 0x353   : > { %2598 = vmatmul.mubr.msk.f32.gmra.mrb[16].mxu0 %vm540_vm1, %v3760_v8 }
 0x354   : > { %2600 = vmatpush1.msk.msra.mxu1 %vm529_vm10, %v2026_v4 }
 0x355   : > { %2601 = vmatmul.mubr.msk.f32.vlgmr.msra.gmra.mrb[16].mxu1 %vm540_vm1, %v3740_v45  ;;  %v829_v45 = vld [vmem:[#allocation6 + $0x30] sm:$0x1] }
 0x356   : > { %2136 = vmatprep.mubr.f32.mxu1 %v2948_v0  ;;  %v830_v0 = vld [vmem:[#allocation6 + $0x38] sm:$0x1] }
 0x359   : > { %2602 = vmatmul.mubr.msk.f32.gmra.mrb[18].mxu1 %vm540_vm1, %v3760_v8 }
 0x38e   : > { %v619_v20 = vpop.f32.mrb[0].mxu1 }
 0x38f   : > { %v621_v5 = vpop.f32.mrb[1].mxu1  ;;  %v4257_v47 = vmul.f32 %v630_v33, %v619_v20 }
 0x390   : > { %v4259_v53 = vmul.f32 %v631_v61, %v621_v5 }
 0x392   : > { %v625_v35 = vpop.f32.mrb[2].mxu1 }
 0x393   : > { %v627_v39 = vpop.f32.mrb[3].mxu1  ;;  %v636_v23 = vmul.f32 %v632_v48, %v625_v35 }
 0x394   : > { %v637_v49 = vmul.f32 %v633_v19, %v627_v39  ;;  %v1222_v19 = vld [vmem:[#allocation6 + $0x68] sm:$0xff] }
 0x3ad   : > { %v815_v42 = vpop.f32.mrb[2].mxu0 }
 0x3ae   : > { %v831_v41 = vmul.f32 %v827_v63, %v815_v42  ;;  %v817_v15 = vpop.f32.mrb[3].mxu0  ;;  %v1221_v63 = vld [vmem:[#allocation6 + $0x60] sm:$0xff] }
 0x3af   : > { %v832_v46 = vmul.f32 %v828_v18, %v817_v15 }
 0x3b0   : > { %v2157_v55 = vrot.slane %v831_v41, 7 }
 0x3b1   : > { %v2158_v7 = vrot.slane %v832_v46, 7  ;;  %v821_v8 = vpop.f32.mrb[4].mxu0 }
 0x3b2   : > { %v4250_v17 = vsel %vm2156_vm2, %v636_v23, %v2157_v55  ;;  %v833_v38 = vmul.f32 %v829_v45, %v821_v8  ;;  %v823_v62 = vpop.f32.mrb[5].mxu0  ;;  %v1223_v45 = vld [vmem:[#allocation6 + $0x70] sm:$0x1] }
 0x3b3   : > { %v4253_v3 = vsel %vm2156_vm2, %v637_v49, %v2158_v7  ;;  %v834_v25 = vmul.f32 %v830_v0, %v823_v62  ;;  %v1224_v0 = vld [vmem:[#allocation6 + $0x78] sm:$0x1] }
 0x3b4   : > { %v2159_v14 = vrot.slane %v833_v38, 7 }
 0x3b5   : > { %v2161_v16 = vrot.slane %v834_v25, 7 }
 0x3b6   : > { %v2160_v54 = vsel %vm2156_vm2, %v2157_v55, %v2159_v14 }
 0x3b7   : > { %v2162_v24 = vsel %vm2156_vm2, %v2158_v7, %v2161_v16 }
 0x3bd   : > { %v1012_v59 = vpop.f32.mrb[4].mxu1 }
 0x3be   : > { %v1028_v9 = vmul.f32 %v1024_v6, %v1012_v59  ;;  %v1014_v40 = vpop.f32.mrb[5].mxu1 }
 0x3bf   : > { %v1029_v11 = vmul.f32 %v1025_v36, %v1014_v40 }
 0x3c0   : > { %v2172_v29 = vrot.slane %v1028_v9, 6 }
 0x3c1   : > { %v2173_v2 = vrot.slane %v1029_v11, 6  ;;  %v1018_v12 = vpop.f32.mrb[6].mxu1 }
 0x3c2   : > { %v4262_v34 = vsel %vm2171_vm3, %v2160_v54, %v2172_v29  ;;  %v1030_v27 = vmul.f32 %v1026_v28, %v1018_v12  ;;  %v1020_v13 = vpop.f32.mrb[7].mxu1  ;;  %v1608_v28 = vld [vmem:[#allocation6 + $0xa0] sm:$0xff] }
 0x3c3   : > { %v2270_v60 = vmax.f32 %v4257_v47, %v4262_v34  ;;  %v4267_v56 = vsel %vm2171_vm3, %v2162_v24, %v2173_v2  ;;  %v1031_v30 = vmul.f32 %v1027_v57, %v1020_v13  ;;  %v1610_v13 = vld [vmem:[#allocation6 + $0xb0] sm:$0x1] }
 0x3c4   : > { %v2287_v1 = vmax.f32 %v4259_v53, %v4267_v56  ;;  %v2174_v32 = vrot.slane %v1030_v27, 6 }
 0x3c5   : > { %v2176_v22 = vrot.slane %v1031_v30, 6 }
 0x3c6   : > { %v2175_v26 = vsel %vm2171_vm3, %v2172_v29, %v2174_v32  ;;  %v1609_v29 = vld [vmem:[#allocation6 + $0xa8] sm:$0xff]  ;;  %v1611_v32 = vld [vmem:[#allocation6 + $0xb8] sm:$0x1] }
 0x3c7   : > { %v2177_v50 = vsel %vm2171_vm3, %v2173_v2, %v2176_v22  ;;  %v1399_v52 = vpop.f32.mrb[8].mxu1 }
 0x3c8   : > { %v1401_v43 = vpop.f32.mrb[9].mxu1  ;;  %v1415_v21 = vmul.f32 %v1411_v51, %v1399_v52 }
 0x3c9   : > { %v1416_v10 = vmul.f32 %v1412_v58, %v1401_v43 }
 0x3ca   : > { %v2201_v35 = vrot.slane %v1415_v21, 4 }
 0x3cb   : > { %v1405_v37 = vpop.f32.mrb[10].mxu1  ;;  %v2202_v48 = vrot.slane %v1416_v10, 4 }
 0x3cc   : > { %v1417_v4 = vmul.f32 %v1413_v44, %v1405_v37  ;;  %v1407_v20 = vpop.f32.mrb[11].mxu1  ;;  %v1805_v37 = vld [vmem:[#allocation6 + $0xc0] sm:$0xff] }
 0x3cd   : > { %v1418_v5 = vmul.f32 %v1414_v31, %v1407_v20 }
 0x3ce   : > { %v2203_v39 = vrot.slane %v1417_v4, 4  ;;  %v1806_v4 = vld [vmem:[#allocation6 + $0xc8] sm:$0xff] }
 0x3cf   : > { %v2205_v18 = vrot.slane %v1418_v5, 4 }
 0x3d0   : > { %v2204_v42 = vsel %vm529_vm10, %v2201_v35, %v2203_v39 }
 0x3d1   : > { %v2206_v23 = vsel %vm529_vm10, %v2202_v48, %v2205_v18 }
 0x3d2   : > { %v1209_v41 = vpop.f32.mrb[6].mxu0 }
 0x3d3   : > { %v1225_v15 = vmul.f32 %v1221_v63, %v1209_v41  ;;  %v1211_v46 = vpop.f32.mrb[7].mxu0  ;;  %v1807_v63 = vld [vmem:[#allocation6 + $0xd0] sm:$0x1] }
 0x3d4   : > { %v1226_v49 = vmul.f32 %v1222_v19, %v1211_v46  ;;  %v1808_v19 = vld [vmem:[#allocation6 + $0xd8] sm:$0x1] }
 0x3d5   : > { %v2187_v55 = vrot.slane %v1225_v15, 5 }
 0x3d6   : > { %v2188_v7 = vrot.slane %v1226_v49, 5  ;;  %v1215_v8 = vpop.f32.mrb[8].mxu0 }
 0x3d7   : > { %v4275_v38 = vsel %vm2186_vm4, %v2175_v26, %v2187_v55  ;;  %v1227_v62 = vmul.f32 %v1223_v45, %v1215_v8  ;;  %v1217_v25 = vpop.f32.mrb[9].mxu0 }
 0x3d8   : > { %v4277_v14 = vsel %vm2186_vm4, %v2177_v50, %v2188_v7  ;;  %v1228_v16 = vmul.f32 %v1224_v0, %v1217_v25  ;;  %v2271_v54 = vmax.f32 %v4250_v17, %v4275_v38 }
 0x3d9   : > { %v2189_v24 = vrot.slane %v1227_v62, 5  ;;  %v2288_v6 = vmax.f32 %v4253_v3, %v4277_v14 }
 0x3da   : > { %v2191_v33 = vrot.slane %v1228_v16, 5  ;;  %v2004_v16 = vld [vmem:[#allocation6 + $0xf0] sm:$0x1] }
 0x3db   : > { %v2190_v36 = vsel %vm2186_vm4, %v2187_v55, %v2189_v24 }
 0x3dc   : > { %v2192_v61 = vsel %vm2186_vm4, %v2188_v7, %v2191_v33  ;;  %v4284_v59 = vsel %vm529_vm10, %v2190_v36, %v2201_v35  ;;  %v2005_v33 = vld [vmem:[#allocation6 + $0xf8] sm:$0x1] }
 0x3dd   : > { %v4287_v9 = vmax.f32 %v2270_v60, %v4284_v59  ;;  %v4290_v40 = vsel %vm529_vm10, %v2192_v61, %v2202_v48  ;;  %v2002_v48 = vld [vmem:[#allocation6 + $0xe0] sm:$0xff] }
 0x3de   : > { %v4293_v11 = vmax.f32 %v2287_v1, %v4290_v40 }
 0x40e   : > { %v1596_v57 = vpop.f32.mrb[10].mxu0 }
 0x40f   : > { %v1612_v2 = vmul.f32 %v1608_v28, %v1596_v57  ;;  %v1598_v12 = vpop.f32.mrb[11].mxu0 }
 0x410   : > { %v1613_v27 = vmul.f32 %v1609_v29, %v1598_v12  ;;  %v2144_v29 = vld [vmem:[#allocation6 + $0x100] sm:$0xff]  ;;  %v2145_v12 = vld [vmem:[#allocation6 + $0x108] sm:$0xff] }
 0x411   : > { %v2216_v30 = vrot.slane %v1612_v2, 3 }
 0x412   : > { %v2217_v22 = vrot.slane %v1613_v27, 3  ;;  %v1602_v26 = vpop.f32.mrb[12].mxu0 }
 0x413   : > { %v4296_v60 = vsel %vm2215_vm5, %v2204_v42, %v2216_v30  ;;  %v1614_v50 = vmul.f32 %v1610_v13, %v1602_v26  ;;  %v1604_v52 = vpop.f32.mrb[13].mxu0  ;;  %v2003_v42 = vld [vmem:[#allocation6 + $0xe8] sm:$0xff] }
 0x414   : > { %v4299_v1 = vsel %vm2215_vm5, %v2206_v23, %v2217_v22  ;;  %v1615_v51 = vmul.f32 %v1611_v32, %v1604_v52  ;;  %v2273_v43 = vmax.f32 %v2271_v54, %v4296_v60 }
 0x415   : > { %v2218_v58 = vrot.slane %v1614_v50, 3  ;;  %v2290_v44 = vmax.f32 %v2288_v6, %v4299_v1 }
 0x416   : > { %v2220_v21 = vrot.slane %v1615_v51, 3 }
 0x417   : > { %v2219_v31 = vsel %vm2215_vm5, %v2216_v30, %v2218_v58 }
 0x418   : > { %v2221_v10 = vsel %vm2215_vm5, %v2217_v22, %v2220_v21 }
 0x41e   : > { %v1793_v20 = vpop.f32.mrb[12].mxu1 }
 0x41f   : > { %v1809_v5 = vmul.f32 %v1805_v37, %v1793_v20  ;;  %v1795_v35 = vpop.f32.mrb[13].mxu1 }
 0x420   : > { %v1810_v39 = vmul.f32 %v1806_v4, %v1795_v35  ;;  %v2147_v4 = vld [vmem:[#allocation6 + $0x118] sm:$0x1] }
 0x421   : > { %v2231_v18 = vrot.slane %v1809_v5, 2 }
 0x422   : > { %v2232_v41 = vrot.slane %v1810_v39, 2  ;;  %v1799_v23 = vpop.f32.mrb[14].mxu1  ;;  %v1990_v15 = vpop.f32.mrb[14].mxu0 }
 0x423   : > { %v4306_v46 = vsel %vm2230_vm6, %v2219_v31, %v2231_v18  ;;  %v1811_v49 = vmul.f32 %v1807_v63, %v1799_v23  ;;  %v1801_v45 = vpop.f32.mrb[15].mxu1  ;;  %v2006_v55 = vmul.f32 %v2002_v48, %v1990_v15  ;;  %v1992_v0 = vpop.f32.mrb[15].mxu0  ;;  %v2146_v31 = vld [vmem:[#allocation6 + $0x110] sm:$0x1] }
 0x424   : > { %v2274_v7 = vmax.f32 %v4287_v9, %v4306_v46  ;;  %v4311_v8 = vsel %vm2230_vm6, %v2221_v10, %v2232_v41  ;;  %v1812_v62 = vmul.f32 %v1808_v19, %v1801_v45  ;;  %v2007_v25 = vmul.f32 %v2003_v42, %v1992_v0 }
 0x425   : > { %v2291_v54 = vmax.f32 %v4293_v11, %v4311_v8  ;;  %v2233_v24 = vrot.slane %v1811_v49, 2  ;;  %v2246_v6 = vrot.slane %v2006_v55, 1 }
 0x426   : > { %v2235_v36 = vrot.slane %v1812_v62, 2  ;;  %v2247_v61 = vrot.slane %v2007_v25, 1  ;;  %v1996_v28 = vpop.f32.mrb[16].mxu0 }
 0x427   : > { %v2234_v57 = vsel %vm2230_vm6, %v2231_v18, %v2233_v24  ;;  %v2008_v9 = vmul.f32 %v2004_v16, %v1996_v28  ;;  %v1998_v2 = vpop.f32.mrb[17].mxu0 }
 0x428   : > { %v2236_v27 = vsel %vm2230_vm6, %v2232_v41, %v2235_v36  ;;  %v2009_v13 = vmul.f32 %v2005_v33, %v1998_v2  ;;  %v2132_v30 = vpop.f32.mrb[16].mxu1  ;;  %v4318_v32 = vsel %vm2245_vm7, %v2234_v57, %v2246_v6 }
 0x429   : > { %v2248_v11 = vrot.slane %v2008_v9, 1  ;;  %v4320_v22 = vmul.f32 %v2144_v29, %v2132_v30  ;;  %v2275_v26 = vmax.f32 %v2273_v43, %v4318_v32  ;;  %v2134_v50 = vpop.f32.mrb[17].mxu1  ;;  %v4324_v52 = vsel %vm2245_vm7, %v2236_v27, %v2247_v61 }
 0x42a   : > { %v2250_v51 = vrot.slane %v2009_v13, 1  ;;  %v4326_v58 = vmul.f32 %v2145_v12, %v2134_v50  ;;  %v2292_v21 = vmax.f32 %v2290_v44, %v4324_v52 }
 0x42b   : > { %v4330_v10 = vsel %vm2245_vm7, %v2246_v6, %v2248_v11  ;;  %v2277_v37 = vmax.f32 %v2275_v26, %v4320_v22 }
 0x42c   : > { %v4334_v20 = vsel %vm2245_vm7, %v2247_v61, %v2250_v51  ;;  %v2294_v43 = vmax.f32 %v2292_v21, %v4326_v58  ;;  %v2138_v5 = vpop.f32.mrb[18].mxu1  ;;  %v2276_v35 = vmax.f32 %v2274_v7, %v4330_v10 }
 0x42d   : > { %v4338_v39 = vmul.f32 %v2146_v31, %v2138_v5  ;;  %v2140_v63 = vpop.f32.mrb[19].mxu1  ;;  %v2293_v44 = vmax.f32 %v2291_v54, %v4334_v20 }
 0x42e   : > { %v4341_v48 = vmul.f32 %v2147_v4, %v2140_v63 }
 0x42f   : > { %v2278_v18 = vsel %vm2156_vm2, %v4338_v39, -inf }
 0x430   : > { %v2279_v19 = vmax.f32 %v2276_v35, %v2278_v18  ;;  %v2295_v42 = vsel %vm2156_vm2, %v4341_v48, -inf }
 0x431   : > { %v2296_v41 = vmax.f32 %v2293_v44, %v2295_v42 }
 0x432   : > { %v2280_v23 = vmax.f32 %v2279_v19, %v2277_v37 }
 0x433   : > { %v2297_v15 = vmax.f32 %v2296_v41, %v2294_v43 }
 0x434   : > { %v2281_v49 = vrot.slane %v2280_v23, 4 }
 0x435   : > { %v2298_v45 = vrot.slane %v2297_v15, 4 }
 0x436   : > { %v2282_v55 = vmax.f32 %v2280_v23, %v2281_v49 }
 0x437   : > { %v2299_v0 = vmax.f32 %v2297_v15, %v2298_v45 }
 0x438   : > { %v2283_v7 = vrot.slane %v2282_v55, 2 }
 0x439   : > { %v2300_v62 = vrot.slane %v2299_v0, 2 }
 0x43a   : > { %v2284_v25 = vmax.f32 %v2282_v55, %v2283_v7 }
 0x43b   : > { %v2301_v16 = vmax.f32 %v2299_v0, %v2300_v62 }
 0x43c   : > { %v2285_v54 = vrot.slane %v2284_v25, 1 }
 0x43d   : > { %v2302_v24 = vrot.slane %v2301_v16, 1 }
 0x43e   : > { %v2286_v6 = vmax.f32 %v2284_v25, %v2285_v54 }
 0x43f   : > { %v4347_v33 = vmax.f32 %v2301_v16, %v2302_v24 }
 0x440   : > { %v2304_v36 = vsub.f32 %v4257_v47, %v2286_v6  ;;  %v2306_v61 = vsub.f32 %v4250_v17, %v2286_v6  ;;  %v2308_v28 = vsub.f32 %v4262_v34, %v2286_v6  ;;  %v2310_v29 = vsub.f32 %v4275_v38, %v2286_v6 }
 0x441   : > { %v2312_v57 = vsub.f32 %v4284_v59, %v2286_v6  ;;  %v2314_v9 = vsub.f32 %v4296_v60, %v2286_v6  ;;  %v2316_v2 = vsub.f32 %v4306_v46, %v2286_v6  ;;  %v2318_v12 = vsub.f32 %v4318_v32, %v2286_v6 }
 0x442   : > { %v2320_v27 = vsub.f32 %v4330_v10, %v2286_v6  ;;  %v2322_v13 = vsub.f32 %v4320_v22, %v2286_v6  ;;  %v2324_v47 = vsub.f32 %v4338_v39, %v2286_v6  ;;  %v2326_v30 = vmul.f32 1.442695, %v2304_v36 }
 0x443   : > { %v2330_v17 = vmul.f32 1.442695, %v2306_v61  ;;  %v2334_v11 = vmul.f32 1.442695, %v2308_v28  ;;  %v2305_v34 = vsub.f32 %v4259_v53, %v4347_v33  ;;  %v2338_v38 = vmul.f32 1.442695, %v2310_v29 }
 0x444   : > { %2763 = vpow2.f32 %v2326_v30  ;;  %v2342_v59 = vmul.f32 1.442695, %v2312_v57  ;;  %v2307_v60 = vsub.f32 %v4253_v3, %v4347_v33  ;;  %v2309_v46 = vsub.f32 %v4267_v56, %v4347_v33 }
 0x445   : > { %2765 = vpow2.f32 %v2330_v17  ;;  %v2311_v32 = vsub.f32 %v4277_v14, %v4347_v33  ;;  %v2313_v22 = vsub.f32 %v4290_v40, %v4347_v33  ;;  %v2315_v53 = vsub.f32 %v4299_v1, %v4347_v33 }
 0x446   : > { %2767 = vpow2.f32 %v2334_v11  ;;  %v2346_v26 = vmul.f32 1.442695, %v2314_v9  ;;  %v2317_v50 = vsub.f32 %v4311_v8, %v4347_v33  ;;  %v2319_v3 = vsub.f32 %v4324_v52, %v4347_v33 }
 0x447   : > { %v2321_v56 = vsub.f32 %v4334_v20, %v4347_v33  ;;  %2769 = vpow2.f32 %v2338_v38  ;;  %v2350_v51 = vmul.f32 1.442695, %v2316_v2  ;;  %v2323_v14 = vsub.f32 %v4326_v58, %v4347_v33 }
 0x448   : > { %v2325_v40 = vsub.f32 %v4341_v48, %v4347_v33  ;;  %v2354_v21 = vmul.f32 1.442695, %v2318_v12  ;;  %2771 = vpow2.f32 %v2342_v59  ;;  %v2328_v1 = vmul.f32 1.442695, %v2305_v34 }
 0x449   : > { %2773 = vpow2.f32 %v2346_v26  ;;  %v2332_v31 = vmul.f32 1.442695, %v2307_v60  ;;  %v2358_v8 = vmul.f32 1.442695, %v2320_v27  ;;  %v2336_v52 = vmul.f32 1.442695, %v2309_v46 }
 0x44a   : > { %2775 = vpow2.f32 %v2350_v51  ;;  %v2366_v4 = vmul.f32 1.442695, %v2324_v47  ;;  %v2340_v20 = vmul.f32 1.442695, %v2311_v32  ;;  %v2362_v5 = vmul.f32 1.442695, %v2322_v13 }
 0x44b   : > { %2777 = vpow2.f32 %v2354_v21  ;;  %v2344_v39 = vmul.f32 1.442695, %v2313_v22  ;;  %v2348_v48 = vmul.f32 1.442695, %v2315_v53  ;;  %v2352_v41 = vmul.f32 1.442695, %v2317_v50 }
 0x44c   : > { %2779 = vpow2.f32 %v2328_v1  ;;  %v2356_v45 = vmul.f32 1.442695, %v2319_v3  ;;  %v2360_v62 = vmul.f32 1.442695, %v2321_v56  ;;  %v2368_v16 = vmul.f32 1.442695, %v2325_v40 }
 0x44d   : > { %2781 = vpow2.f32 %v2332_v31  ;;  %v2364_v33 = vmul.f32 1.442695, %v2323_v14 }
 0x44e   : > { %v4382_v10 = vpop.eup %2763  ;;  %2783 = vpow2.f32 %v2358_v8 }
 0x44f   : > { %v4384_v37 = vpop.eup %2765  ;;  %2785 = vpow2.f32 %v2336_v52 }
 0x450   : > { %v2370_v58 = vadd.f32 %v4384_v37, %v4382_v10  ;;  %v4388_v43 = vpop.eup %2767  ;;  %2787 = vpow2.f32 %v2366_v4 }
 0x451   : > { %v4391_v63 = vpop.eup %2769  ;;  %2789 = vpow2.f32 %v2340_v20 }
 0x452   : > { %v2371_v35 = vadd.f32 %v4388_v43, %v2370_v58  ;;  %v4394_v18 = vpop.eup %2771  ;;  %2791 = vpow2.f32 %v2362_v5 }
 0x453   : > { %v4396_v19 = vpop.eup %2773  ;;  %2793 = vpow2.f32 %v2344_v39 }
 0x454   : > { %v2372_v44 = vadd.f32 %v4391_v63, %v2371_v35  ;;  %v4399_v23 = vpop.eup %2775  ;;  %2795 = vpow2.f32 %v2348_v48 }
 0x455   : > { %v4401_v15 = vpop.eup %2777  ;;  %2797 = vpow2.f32 %v2352_v41 }
 0x456   : > { %v2373_v42 = vadd.f32 %v4394_v18, %v2372_v44  ;;  %v4404_v55 = vpop.eup %2779  ;;  %2799 = vpow2.f32 %v2356_v45 }
 0x457   : > { %v4406_v0 = vpop.eup %2781  ;;  %2801 = vpow2.f32 %v2360_v62 }
 0x458   : > { %v2374_v49 = vadd.f32 %v4396_v19, %v2373_v42  ;;  %v2784_v25 = vpop.eup %2783  ;;  %v2387_v54 = vadd.f32 %v4406_v0, %v4404_v55  ;;  %2803 = vpow2.f32 %v2368_v16 }
 0x459   : > { %v4411_v24 = vpop.eup %2785  ;;  %2805 = vpow2.f32 %v2364_v33 }
 0x45a   : > { %v2375_v7 = vadd.f32 %v4399_v23, %v2374_v49  ;;  %v2788_v36 = vpop.eup %2787  ;;  %v2388_v61 = vadd.f32 %v4411_v24, %v2387_v54 }
 0x45b   : > { %v4415_v28 = vpop.eup %2789  ;;  %v2379_v27 = vsel %vm2156_vm2, %v2788_v36, 0.0 }
 0x45c   : > { %v2376_v6 = vadd.f32 %v4401_v15, %v2375_v7  ;;  %v2792_v57 = vpop.eup %2791  ;;  %v2389_v9 = vadd.f32 %v4415_v28, %v2388_v61 }
 0x45d   : > { %v4418_v2 = vpop.eup %2793 }
 0x45e   : > { %v2377_v29 = vadd.f32 %v2784_v25, %v2376_v6  ;;  %v2390_v13 = vadd.f32 %v4418_v2, %v2389_v9  ;;  %v2796_v47 = vpop.eup %2795 }
 0x45f   : > { %v2798_v11 = vpop.eup %2797 }
 0x460   : > { %v2378_v12 = vadd.f32 %v2792_v57, %v2377_v29  ;;  %v2391_v17 = vadd.f32 %v2796_v47, %v2390_v13  ;;  %v2800_v59 = vpop.eup %2799 }
 0x461   : > { %v2802_v32 = vpop.eup %2801 }
 0x462   : > { %v2380_v30 = vadd.f32 %v2379_v27, %v2378_v12  ;;  %v2392_v38 = vadd.f32 %v2798_v11, %v2391_v17  ;;  %v2804_v53 = vpop.eup %2803 }
 0x463   : > { %v2806_v50 = vpop.eup %2805  ;;  %v2396_v14 = vsel %vm2156_vm2, %v2804_v53, 0.0 }
 0x464   : > { %v2381_v34 = vrot.slane %v2380_v30, 4  ;;  %v2393_v46 = vadd.f32 %v2800_v59, %v2392_v38 }
 0x466   : > { %v2382_v60 = vadd.f32 %v2381_v34, %v2380_v30  ;;  %v2394_v26 = vadd.f32 %v2802_v32, %v2393_v46 }
 0x468   : > { %v2383_v22 = vrot.slane %v2382_v60, 2  ;;  %v2395_v56 = vadd.f32 %v2806_v50, %v2394_v26 }
 0x46a   : > { %v2384_v3 = vadd.f32 %v2383_v22, %v2382_v60  ;;  %v2397_v40 = vadd.f32 %v2396_v14, %v2395_v56 }
 0x46c   : > { %v2385_v51 = vrot.slane %v2384_v3, 1  ;;  %v2398_v1 = vrot.slane %v2397_v40, 4 }
 0x46e   : > { %v2386_v21 = vadd.f32 %v2385_v51, %v2384_v3  ;;  %v2399_v31 = vadd.f32 %v2398_v1, %v2397_v40 }
 0x470   : > { %2807 = vrcp.f32 %v2386_v21  ;;  %v2400_v8 = vrot.slane %v2399_v31, 2 }
 0x472   : > { %v2401_v52 = vadd.f32 %v2400_v8, %v2399_v31 }
 0x474   : > { %v2402_v4 = vrot.slane %v2401_v52, 1 }
 0x476   : > { %v2403_v58 = vadd.f32 %v2402_v4, %v2401_v52 }
 0x478   : > { %2809 = vrcp.f32 %v2403_v58 }
 0x47a   : > { %v2808_v20 = vpop.eup %2807 }
 0x47b   : > { %v2408_v5 = vmul.f32 %v2808_v20, %v4382_v10  ;;  %v2410_v35 = vmul.f32 %v2808_v20, %v4384_v37  ;;  %v2412_v39 = vmul.f32 %v2808_v20, %v4388_v43  ;;  %v2414_v44 = vmul.f32 %v2808_v20, %v4391_v63 }
 0x47c   : > { %v2416_v48 = vmul.f32 %v2808_v20, %v4394_v18  ;;  %v2418_v42 = vmul.f32 %v2808_v20, %v4396_v19  ;;  %v2420_v41 = vmul.f32 %v2808_v20, %v4399_v23  ;;  %v2422_v10 = vmul.f32 %v2808_v20, %v4401_v15 }
 0x47d   : > { %v2424_v49 = vmul.f32 %v2808_v20, %v2784_v25  ;;  %v2426_v37 = vmul.f32 %v2808_v20, %v2792_v57  ;;  %v2428_v45 = vmul.f32 %v2808_v20, %v2788_v36  ;;  %2430 = vst [vmem:[%s4428_s20] sm:$0xff] %v2408_v5  ;;  %2432 = vst [vmem:[%s4428_s20 + $0x10] sm:$0xff] %v2410_v35 }
 0x47e   : > { %2434 = vst [vmem:[%s4428_s20 + $0x20] sm:$0xff] %v2412_v39  ;;  %2436 = vst [vmem:[%s4428_s20 + $0x30] sm:$0xff] %v2414_v44 }
 0x47f   : > { %2438 = vst [vmem:[%s4428_s20 + $0x40] sm:$0xff] %v2416_v48  ;;  %2440 = vst [vmem:[%s4428_s20 + $0x50] sm:$0xff] %v2418_v42 }
 0x480   : > { %2442 = vst [vmem:[%s4428_s20 + $0x60] sm:$0xff] %v2420_v41  ;;  %2444 = vst [vmem:[%s4428_s20 + $0x70] sm:$0xff] %v2422_v10 }
 0x481   : > { %2446 = vst [vmem:[%s4428_s20 + $0x80] sm:$0xff] %v2424_v49  ;;  %2448 = vst [vmem:[%s4428_s20 + $0x90] sm:$0xff] %v2426_v37 }
 0x482   : > { %2450 = vst [vmem:[%s4428_s20 + $0xa0] sm:$0x1] %v2428_v45  ;;  %v2810_v43 = vpop.eup %2809 }
 0x483   : > { %v2409_v63 = vmul.f32 %v2810_v43, %v4404_v55  ;;  %v2411_v18 = vmul.f32 %v2810_v43, %v4406_v0  ;;  %v2413_v19 = vmul.f32 %v2810_v43, %v4411_v24  ;;  %v2415_v23 = vmul.f32 %v2810_v43, %v4415_v28 }
 0x484   : > { %v2417_v15 = vmul.f32 %v2810_v43, %v4418_v2  ;;  %v2419_v7 = vmul.f32 %v2810_v43, %v2796_v47  ;;  %v2421_v62 = vmul.f32 %v2810_v43, %v2798_v11  ;;  %v2423_v25 = vmul.f32 %v2810_v43, %v2800_v59 }
 0x485   : > { %v2425_v16 = vmul.f32 %v2810_v43, %v2802_v32  ;;  %v2427_v54 = vmul.f32 %v2810_v43, %v2806_v50  ;;  %v2429_v55 = vmul.f32 %v2810_v43, %v2804_v53  ;;  %2431 = vst [vmem:[%s4428_s20 + $0x8] sm:$0xff] %v2409_v63  ;;  %2433 = vst [vmem:[%s4428_s20 + $0x18] sm:$0xff] %v2411_v18 }
 0x486   : > { %2435 = vst [vmem:[%s4428_s20 + $0x28] sm:$0xff] %v2413_v19  ;;  %2437 = vst [vmem:[%s4428_s20 + $0x38] sm:$0xff] %v2415_v23 }
 0x487   : > { %2439 = vst [vmem:[%s4428_s20 + $0x48] sm:$0xff] %v2417_v15  ;;  %2441 = vst [vmem:[%s4428_s20 + $0x58] sm:$0xff] %v2419_v7 }
 0x488   : > { %2443 = vst [vmem:[%s4428_s20 + $0x68] sm:$0xff] %v2421_v62  ;;  %2445 = vst [vmem:[%s4428_s20 + $0x78] sm:$0xff] %v2423_v25 }
 0x489   : > { %2447 = vst [vmem:[%s4428_s20 + $0x88] sm:$0xff] %v2425_v16  ;;  %2449 = vst [vmem:[%s4428_s20 + $0x98] sm:$0xff] %v2427_v54 }
 0x48a   : > { %2451 = vst [vmem:[%s4428_s20 + $0xa8] sm:$0x1] %v2429_v55 }
 0x48b PF: > { %p19_p9 = scmp.ge.s32.totalorder %s3044_s7, 4   ;;  %s4501_s21 = smov %s2933_s22 }
 0x48c   : > { %s4502_s22 = smov %s2937_s23  ;;  %s4503_s23 = smov %s3073_s28 }
 0x48d   : > { %s4504_s24 = smov %s3044_s7  ;;  %21 = sbr.rel (!%p19_p9) target bundleno = 5 (0x5), region = 109 }
 0x494   :  { %2473 = vsyncpa [#allocation3], 1 }
 0x495   :  { %2475 = vsyncpa [#allocation3 + $0x1], 1 }
 0x496   :  { %2476 = vsyncpa [#allocation5], 1 }
 0x497   :  { %2478 = vsyncpa [#allocation5 + $0x1], 1 }

</bundles_post_ra>
